<compile_context>
chip_gen: v7x
topology: tpu7x:2x2x1
jax: 0.10.0
libtpu: 0.0.40
codegen_flags: <defaults>
</compile_context>

<pallas_src>
import jax
import jax.numpy as jnp
from jax.experimental import pallas as pl
from jax.experimental.pallas import tpu as pltpu

_COL0 = 8  # sublane-aligned column at which the real data sits inside the scratch


def dwconv3x3_kernel(x_ref, w_ref, o_ref, xpad_ref):
    """Depthwise 3x3 / stride 1 / pad 1 over one (batch, channel-block) tile.

    x_ref   : (1, H, W, Cb)              unpadded input tile
    w_ref   : (3, 3, Cb)                 per-channel filter taps
    o_ref   : (1, H, W, Cb)              output tile
    xpad_ref: (1, H+2, _COL0+W+2, Cb)    f32 VMEM scratch (zero-padded tile)
    """
    H = o_ref.shape[1]
    W = o_ref.shape[2]

    # Hoisted weight load + cast: one ref read instead of nine.
    w = w_ref[...].astype(jnp.float32)  # (3, 3, Cb)

    # Build the zero-padded tile in VMEM (halo handled in-kernel, no wrapper pad).
    # The interior store starts at a multiple-of-8 sublane offset -> aligned store.
    xpad_ref[...] = jnp.zeros_like(xpad_ref)
    xpad_ref[:, 1:H + 1, _COL0:_COL0 + W, :] = x_ref[...].astype(jnp.float32)

    # Three column windows (kw = 0, 1, 2  <->  dw = -1, 0, +1).  Only kw=0 and
    # kw=2 need a 1-sublane realignment; each window is loaded once and reused
    # for all three kh taps (row shifts are outer-axis slices: cheap).
    acc = jnp.zeros(o_ref.shape, jnp.float32)
    for kw in range(3):
        col = _COL0 - 1 + kw
        win = xpad_ref[:, :, col:col + W, :]          # (1, H+2, W, Cb)
        for kh in range(3):
            acc = acc + win[:, kh:kh + H] * w[kh, kw, :]

    o_ref[...] = acc.astype(o_ref.dtype)


def _pick_block_c(c_pad, cap=256):
    """Largest multiple of 128 that divides c_pad and is <= cap."""
    bc = min(cap, c_pad)
    while c_pad % bc:
        bc -= 128
    return bc


def depthwise_conv3x3_nhwc(x_nhwc, w_hwc, block_c=None):
    """Depthwise 3x3 conv, NHWC activations; w_hwc: (3, 3, C)."""
    N, H, W, C = x_nhwc.shape
    assert w_hwc.shape == (3, 3, C)

    # Channel axis must tile by 128 lanes; pad the tail block if needed so the
    # last channel block never goes out of range.
    c_pad = ((C + 127) // 128) * 128
    if c_pad != C:
        x_nhwc = jnp.pad(x_nhwc, ((0, 0), (0, 0), (0, 0), (0, c_pad - C)))
        w_hwc = jnp.pad(w_hwc, ((0, 0), (0, 0), (0, c_pad - C)))
    if block_c is None:
        block_c = _pick_block_c(c_pad)
    num_cb = c_pad // block_c

    out = pl.pallas_call(
        dwconv3x3_kernel,
        out_shape=jax.ShapeDtypeStruct((N, H, W, c_pad), x_nhwc.dtype),
        grid_spec=pltpu.PrefetchScalarGridSpec(
            num_scalar_prefetch=0,
            # Channel blocks on the slow axis so the (tiny) weight block stays
            # resident while batch sweeps on the fast axis.
            grid=(num_cb, N),
            in_specs=[
                pl.BlockSpec((1, H, W, block_c), lambda cb, n: (n, 0, 0, cb)),
                pl.BlockSpec((3, 3, block_c), lambda cb, n: (0, 0, cb)),
            ],
            out_specs=pl.BlockSpec((1, H, W, block_c), lambda cb, n: (n, 0, 0, cb)),
            scratch_shapes=[
                pltpu.VMEM((1, H + 2, _COL0 + W + 2, block_c), jnp.float32),
            ],
        ),
        compiler_params=pltpu.CompilerParams(
            # Both grid axes are independent -> megacore (v7x) can split them.
            dimension_semantics=("parallel", "parallel")),
    )(x_nhwc, w_hwc)

    if c_pad != C:
        out = out[..., :C]
    return out


def depthwise_conv3x3(x_nchw, w_oihw, block_c=None):
    """PyTorch-convention entry point: x (N, C, H, W), w (C, 1, 3, 3)."""
    N, C, H, W = x_nchw.shape
    assert w_oihw.shape == (C, 1, 3, 3)
    # TODO(synk): these NCHW<->NHWC transposes are XLA glue around the kernel;
    # carry activations in NHWC end-to-end (call depthwise_conv3x3_nhwc) in the
    # surrounding model to remove the two extra HBM round trips.
    x = jnp.transpose(x_nchw, (0, 2, 3, 1))
    w = jnp.transpose(w_oihw[:, 0, :, :], (1, 2, 0))
    out = depthwise_conv3x3_nhwc(x, w, block_c=block_c)
    return jnp.transpose(out, (0, 3, 1, 2))


def reference_conv(x_nchw, w_oihw):
    C = x_nchw.shape[1]
    return jax.lax.conv_general_dilated(
        x_nchw, w_oihw,
        window_strides=(1, 1),
        padding=((1, 1), (1, 1)),
        dimension_numbers=("NCHW", "OIHW", "NCHW"),
        feature_group_count=C,
    )


if __name__ == "__main__":
    # Small shapes consistent with the module (original: N=1, C=960, H=W=14).
    # C=320 exercises the channel-padding path (320 -> 384 = 3 blocks of 128).
    N, C, H, W = 2, 320, 14, 14

    key = jax.random.PRNGKey(0)
    kx, kw = jax.random.split(key)
    x = jax.random.normal(kx, (N, C, H, W), dtype=jnp.float32)
    # Deterministic parameter init (Conv2d depthwise weight shape: (C, 1, 3, 3)).
    wgt = jax.random.normal(kw, (C, 1, 3, 3), dtype=jnp.float32) * 0.1

    fn = jax.jit(depthwise_conv3x3)
    out = jax.block_until_ready(fn(x, wgt))

    ref = jax.block_until_ready(reference_conv(x, wgt))
    assert out.shape == (N, C, H, W)
    assert jnp.allclose(out, ref, atol=1e-4, rtol=1e-4)

    print("KERNEL_OK")
</pallas_src>

<mosaic_0001>
module attributes {stable_mosaic.version = 11 : i64} {
  func.func @dwconv3x3_kernel(%arg0: i32, %arg1: i32, %arg2: memref<1x14x14x128xf32, #tpu.memory_space<vmem>>, %arg3: memref<3x3x128xf32, #tpu.memory_space<vmem>>, %arg4: memref<1x14x14x128xf32, #tpu.memory_space<vmem>>, %arg5: memref<1x16x24x128xf32, #tpu.memory_space<vmem>>) attributes {dimension_semantics = [#tpu.dimension_semantics<parallel>, #tpu.dimension_semantics<parallel>], iteration_bounds = array<i64: 3, 2>, scalar_prefetch = 0 : i64, scratch_operands = 1 : i64, tpu.core_type = #tpu.core_type<tc>, window_params = [{transform_indices = @transform_0, window_bounds = array<i64: 1, 14, 14, 128>}, {transform_indices = @transform_1, window_bounds = array<i64: 3, 3, 128>}, {transform_indices = @transform_2, window_bounds = array<i64: 1, 14, 14, 128>}]} {
    %c0 = arith.constant 0 : index
    %c0_0 = arith.constant 0 : index
    %c0_1 = arith.constant 0 : index
    %0 = vector.load %arg3[%c0, %c0_0, %c0_1] : memref<3x3x128xf32, #tpu.memory_space<vmem>>, vector<3x3x128xf32>
    %cst = arith.constant 0.000000e+00 : f32
    %1 = vector.broadcast %cst : f32 to vector<1x16x24x128xf32>
    %c0_2 = arith.constant 0 : index
    %c0_3 = arith.constant 0 : index
    %c0_4 = arith.constant 0 : index
    %c0_5 = arith.constant 0 : index
    %2 = vector.load %arg5[%c0_2, %c0_3, %c0_4, %c0_5] : memref<1x16x24x128xf32, #tpu.memory_space<vmem>>, vector<1x16x24x128xf32>
    tpu.vector_store %arg5[%c0_2, %c0_3, %c0_4, %c0_5], %1 {strides = array<i32>} : memref<1x16x24x128xf32, #tpu.memory_space<vmem>>, vector<1x16x24x128xf32>,
    %c0_6 = arith.constant 0 : index
    %c0_7 = arith.constant 0 : index
    %c0_8 = arith.constant 0 : index
    %c0_9 = arith.constant 0 : index
    %3 = vector.load %arg2[%c0_6, %c0_7, %c0_8, %c0_9] : memref<1x14x14x128xf32, #tpu.memory_space<vmem>>, vector<1x14x14x128xf32>
    %c0_10 = arith.constant 0 : index
    %c1 = arith.constant 1 : index
    %c8 = arith.constant 8 : index
    %c0_11 = arith.constant 0 : index
    %4 = vector.load %arg5[%c0_10, %c1, %c8, %c0_11] : memref<1x16x24x128xf32, #tpu.memory_space<vmem>>, vector<1x14x14x128xf32>
    tpu.vector_store %arg5[%c0_10, %c1, %c8, %c0_11], %3 {strides = array<i32>} : memref<1x16x24x128xf32, #tpu.memory_space<vmem>>, vector<1x14x14x128xf32>,
    %cst_12 = arith.constant 0.000000e+00 : f32
    %5 = vector.broadcast %cst_12 : f32 to vector<1x14x14x128xf32>
    %c0_13 = arith.constant 0 : index
    %c0_14 = arith.constant 0 : index
    %c7 = arith.constant 7 : index
    %c0_15 = arith.constant 0 : index
    %6 = vector.load %arg5[%c0_13, %c0_14, %c7, %c0_15] : memref<1x16x24x128xf32, #tpu.memory_space<vmem>>, vector<1x16x14x128xf32>
    %7 = vector.extract_strided_slice %6 {offsets = [0, 0, 0, 0], sizes = [1, 14, 14, 128], strides = [1, 1, 1, 1]} : vector<1x16x14x128xf32> to vector<1x14x14x128xf32>
    %8 = vector.extract_strided_slice %0 {offsets = [0, 0, 0], sizes = [1, 1, 128], strides = [1, 1, 1]} : vector<3x3x128xf32> to vector<1x1x128xf32>
    %9 = vector.shape_cast %8 : vector<1x1x128xf32> to vector<128xf32>
    %10 = vector.shape_cast %9 : vector<128xf32> to vector<1x1x1x128xf32>
    %11 = vector.broadcast %10 : vector<1x1x1x128xf32> to vector<1x14x14x128xf32>
    %12 = arith.mulf %7, %11 : vector<1x14x14x128xf32>
    %13 = arith.addf %5, %12 : vector<1x14x14x128xf32>
    %14 = vector.extract_strided_slice %6 {offsets = [0, 1, 0, 0], sizes = [1, 14, 14, 128], strides = [1, 1, 1, 1]} : vector<1x16x14x128xf32> to vector<1x14x14x128xf32>
    %15 = vector.extract_strided_slice %0 {offsets = [1, 0, 0], sizes = [1, 1, 128], strides = [1, 1, 1]} : vector<3x3x128xf32> to vector<1x1x128xf32>
    %16 = vector.shape_cast %15 : vector<1x1x128xf32> to vector<128xf32>
    %17 = vector.shape_cast %16 : vector<128xf32> to vector<1x1x1x128xf32>
    %18 = vector.broadcast %17 : vector<1x1x1x128xf32> to vector<1x14x14x128xf32>
    %19 = arith.mulf %14, %18 : vector<1x14x14x128xf32>
    %20 = arith.addf %13, %19 : vector<1x14x14x128xf32>
    %21 = vector.extract_strided_slice %6 {offsets = [0, 2, 0, 0], sizes = [1, 14, 14, 128], strides = [1, 1, 1, 1]} : vector<1x16x14x128xf32> to vector<1x14x14x128xf32>
    %22 = vector.extract_strided_slice %0 {offsets = [2, 0, 0], sizes = [1, 1, 128], strides = [1, 1, 1]} : vector<3x3x128xf32> to vector<1x1x128xf32>
    %23 = vector.shape_cast %22 : vector<1x1x128xf32> to vector<128xf32>
    %24 = vector.shape_cast %23 : vector<128xf32> to vector<1x1x1x128xf32>
    %25 = vector.broadcast %24 : vector<1x1x1x128xf32> to vector<1x14x14x128xf32>
    %26 = arith.mulf %21, %25 : vector<1x14x14x128xf32>
    %27 = arith.addf %20, %26 : vector<1x14x14x128xf32>
    %c0_16 = arith.constant 0 : index
    %c0_17 = arith.constant 0 : index
    %c8_18 = arith.constant 8 : index
    %c0_19 = arith.constant 0 : index
    %28 = vector.load %arg5[%c0_16, %c0_17, %c8_18, %c0_19] : memref<1x16x24x128xf32, #tpu.memory_space<vmem>>, vector<1x16x14x128xf32>
    %29 = vector.extract_strided_slice %28 {offsets = [0, 0, 0, 0], sizes = [1, 14, 14, 128], strides = [1, 1, 1, 1]} : vector<1x16x14x128xf32> to vector<1x14x14x128xf32>
    %30 = vector.extract_strided_slice %0 {offsets = [0, 1, 0], sizes = [1, 1, 128], strides = [1, 1, 1]} : vector<3x3x128xf32> to vector<1x1x128xf32>
    %31 = vector.shape_cast %30 : vector<1x1x128xf32> to vector<128xf32>
    %32 = vector.shape_cast %31 : vector<128xf32> to vector<1x1x1x128xf32>
    %33 = vector.broadcast %32 : vector<1x1x1x128xf32> to vector<1x14x14x128xf32>
    %34 = arith.mulf %29, %33 : vector<1x14x14x128xf32>
    %35 = arith.addf %27, %34 : vector<1x14x14x128xf32>
    %36 = vector.extract_strided_slice %28 {offsets = [0, 1, 0, 0], sizes = [1, 14, 14, 128], strides = [1, 1, 1, 1]} : vector<1x16x14x128xf32> to vector<1x14x14x128xf32>
    %37 = vector.extract_strided_slice %0 {offsets = [1, 1, 0], sizes = [1, 1, 128], strides = [1, 1, 1]} : vector<3x3x128xf32> to vector<1x1x128xf32>
    %38 = vector.shape_cast %37 : vector<1x1x128xf32> to vector<128xf32>
    %39 = vector.shape_cast %38 : vector<128xf32> to vector<1x1x1x128xf32>
    %40 = vector.broadcast %39 : vector<1x1x1x128xf32> to vector<1x14x14x128xf32>
    %41 = arith.mulf %36, %40 : vector<1x14x14x128xf32>
    %42 = arith.addf %35, %41 : vector<1x14x14x128xf32>
    %43 = vector.extract_strided_slice %28 {offsets = [0, 2, 0, 0], sizes = [1, 14, 14, 128], strides = [1, 1, 1, 1]} : vector<1x16x14x128xf32> to vector<1x14x14x128xf32>
    %44 = vector.extract_strided_slice %0 {offsets = [2, 1, 0], sizes = [1, 1, 128], strides = [1, 1, 1]} : vector<3x3x128xf32> to vector<1x1x128xf32>
    %45 = vector.shape_cast %44 : vector<1x1x128xf32> to vector<128xf32>
    %46 = vector.shape_cast %45 : vector<128xf32> to vector<1x1x1x128xf32>
    %47 = vector.broadcast %46 : vector<1x1x1x128xf32> to vector<1x14x14x128xf32>
    %48 = arith.mulf %43, %47 : vector<1x14x14x128xf32>
    %49 = arith.addf %42, %48 : vector<1x14x14x128xf32>
    %c0_20 = arith.constant 0 : index
    %c0_21 = arith.constant 0 : index
    %c9 = arith.constant 9 : index
    %c0_22 = arith.constant 0 : index
    %50 = vector.load %arg5[%c0_20, %c0_21, %c9, %c0_22] : memref<1x16x24x128xf32, #tpu.memory_space<vmem>>, vector<1x16x14x128xf32>
    %51 = vector.extract_strided_slice %50 {offsets = [0, 0, 0, 0], sizes = [1, 14, 14, 128], strides = [1, 1, 1, 1]} : vector<1x16x14x128xf32> to vector<1x14x14x128xf32>
    %52 = vector.extract_strided_slice %0 {offsets = [0, 2, 0], sizes = [1, 1, 128], strides = [1, 1, 1]} : vector<3x3x128xf32> to vector<1x1x128xf32>
    %53 = vector.shape_cast %52 : vector<1x1x128xf32> to vector<128xf32>
    %54 = vector.shape_cast %53 : vector<128xf32> to vector<1x1x1x128xf32>
    %55 = vector.broadcast %54 : vector<1x1x1x128xf32> to vector<1x14x14x128xf32>
    %56 = arith.mulf %51, %55 : vector<1x14x14x128xf32>
    %57 = arith.addf %49, %56 : vector<1x14x14x128xf32>
    %58 = vector.extract_strided_slice %50 {offsets = [0, 1, 0, 0], sizes = [1, 14, 14, 128], strides = [1, 1, 1, 1]} : vector<1x16x14x128xf32> to vector<1x14x14x128xf32>
    %59 = vector.extract_strided_slice %0 {offsets = [1, 2, 0], sizes = [1, 1, 128], strides = [1, 1, 1]} : vector<3x3x128xf32> to vector<1x1x128xf32>
    %60 = vector.shape_cast %59 : vector<1x1x128xf32> to vector<128xf32>
    %61 = vector.shape_cast %60 : vector<128xf32> to vector<1x1x1x128xf32>
    %62 = vector.broadcast %61 : vector<1x1x1x128xf32> to vector<1x14x14x128xf32>
    %63 = arith.mulf %58, %62 : vector<1x14x14x128xf32>
    %64 = arith.addf %57, %63 : vector<1x14x14x128xf32>
    %65 = vector.extract_strided_slice %50 {offsets = [0, 2, 0, 0], sizes = [1, 14, 14, 128], strides = [1, 1, 1, 1]} : vector<1x16x14x128xf32> to vector<1x14x14x128xf32>
    %66 = vector.extract_strided_slice %0 {offsets = [2, 2, 0], sizes = [1, 1, 128], strides = [1, 1, 1]} : vector<3x3x128xf32> to vector<1x1x128xf32>
    %67 = vector.shape_cast %66 : vector<1x1x128xf32> to vector<128xf32>
    %68 = vector.shape_cast %67 : vector<128xf32> to vector<1x1x1x128xf32>
    %69 = vector.broadcast %68 : vector<1x1x1x128xf32> to vector<1x14x14x128xf32>
    %70 = arith.mulf %65, %69 : vector<1x14x14x128xf32>
    %71 = arith.addf %64, %70 : vector<1x14x14x128xf32>
    %c0_23 = arith.constant 0 : index
    %c0_24 = arith.constant 0 : index
    %c0_25 = arith.constant 0 : index
    %c0_26 = arith.constant 0 : index
    %72 = vector.load %arg4[%c0_23, %c0_24, %c0_25, %c0_26] : memref<1x14x14x128xf32, #tpu.memory_space<vmem>>, vector<1x14x14x128xf32>
    tpu.vector_store %arg4[%c0_23, %c0_24, %c0_25, %c0_26], %71 {strides = array<i32>} : memref<1x14x14x128xf32, #tpu.memory_space<vmem>>, vector<1x14x14x128xf32>,
    return
  }
  func.func @transform_0(%arg0: i32, %arg1: i32) -> (i32, i32, i32, i32) {
    %c0_i32 = arith.constant 0 : i32
    %c0_i32_0 = arith.constant 0 : i32
    %c0_i32_1 = arith.constant 0 : i32
    return %arg1, %c0_i32, %c0_i32_0, %arg0 : i32, i32, i32, i32
  }
  func.func @transform_1(%arg0: i32, %arg1: i32) -> (i32, i32, i32) {
    %c0_i32 = arith.constant 0 : i32
    %c0_i32_0 = arith.constant 0 : i32
    %c0_i32_1 = arith.constant 0 : i32
    return %c0_i32, %c0_i32_0, %arg0 : i32, i32, i32
  }
  func.func @transform_2(%arg0: i32, %arg1: i32) -> (i32, i32, i32, i32) {
    %c0_i32 = arith.constant 0 : i32
    %c0_i32_0 = arith.constant 0 : i32
    %c0_i32_1 = arith.constant 0 : i32
    return %arg1, %c0_i32, %c0_i32_0, %arg0 : i32, i32, i32, i32
  }
}

</mosaic_0001>

<bundles_post_ra>
// kernel: depthwise_conv3x3.1
= control target key start
LH: loop header
LB: loop body
LE: loop exit
PB: predicated region body
PF: predicated region fallthrough
CT: control target
= control target key end

     0   :  { %s1560_s9 = smov 0   ;;  %s1562_s10 = smov 0   ;;  %s2533_s0 = inlined_call_operand.vmem [shape: f32[2,14,14,384], index: 0, kind: input, shape index: {}]   ;;  %s2534_s1 = inlined_call_operand.vmem [shape: f32[3,3,384], index: 1, kind: input, shape index: {}]   ;;  %s2535_s2 = inlined_call_operand.vmem [shape: f32[2,14,14,384], index: 2, kind: output, shape index: {}]  }
   0x1   :  { %s1564_s11 = smov 0   ;;  %s1566_s12 = smov 0  }
   0x2   :  { %s1568_s13 = smov 0   ;;  %s1570_s14 = smov 0  }
   0x3   :  { %s1572_s15 = smov 0   ;;  %s1574_s16 = smov 0  }
   0x4   :  { %s1576_s17 = smov 0  }
   0x5 LB: > { %s21_s18 = sadd.s32 1, %s1534_s15  ;;  %s24_s19 = sadd.s32 1, %s1538_s16  ;;  %s1542_s17 = sphi %s1576_s17, %s12_s17   ;;  %s1538_s16 = sphi %s1574_s16, %s2546_s16   ;;  %s1534_s15 = sphi %s1572_s15, %s2545_s15   ;;  %s1530_s14 = sphi %s1570_s14, %s2544_s14   ;;  %s1526_s13 = sphi %s1568_s13, %s2543_s13   ;;  %s1522_s12 = sphi %s1566_s12, %s2542_s12   ;;  %s1518_s11 = sphi %s1564_s11, %s2541_s11   ;;  %s1514_s10 = sphi %s1562_s10, %s2540_s10   ;;  %s1510_s9 = sphi %s1560_s9, %s2539_s9  }
   0x6   : > { %p22_p0 = scmp.ge.s32.totalorder %s21_s18, 2  ;;  %s1380_s20 = sadd.s32 4294967295, %s1542_s17  }
   0x7   : > { %p40_p1 = scmp.ne.s32.totalorder %s1522_s12, %s1518_s11  ;;  %s33_s21 = sadd.s32 1, %s1522_s12 }
   0x8   : > { %s2548_s18 = smov (%p22_p0, %s21_s18), 0  ;;  %s2550_s19 = smov (!%p22_p0, %s24_s19), %s1538_s16 }
   0x9   : > { %p41_p2 = scmp.eq.s32.totalorder %s1542_s17, 0  ;;  %p26_p3 = scmp.ge.s32.totalorder %s2550_s19, 3 }
   0xa   : > { %s28_s22 = ssub.s32 %s1534_s15, %s2548_s18  ;;  %p66_p5 = scmp.ne.s32.totalorder %s1514_s10, %s1510_s9 }
   0xb   : > { %p1620_p4 = por %p41_p2, %p40_p1  ;;  %s2552_s19 = smov (%p26_p3, %s2550_s19), 0 }
   0xc   : > { %p1628_p6 = por %p66_p5, %p41_p2  ;;  %p98_p7 = scmp.eq.s32.totalorder %s1380_s20, 5 }
   0xd   : > { %s29_s25 = ssub.s32 %s1538_s16, %s2552_s19  ;;  %s59_s26 = sadd.s32 1, %s1514_s10 }
   0xe   : > { %s30_s27 = sor.u32 %s29_s25, %s28_s22  ;;  %p57_p8 = scmp.eq.s32.totalorder %s29_s25, 0 }
   0xf   : > { %p31_p9 = scmp.eq.s32.totalorder %s30_s27, 0  ;;  %p1638_p10 = por %p98_p7, %p40_p1 }
  0x10   : > { %s1643_s29 = scalar_select %p57_p8, %s1514_s10, %s59_s26  }
  0x11   : > { %s1646_s30 = scalar_select %p31_p9, %s1522_s12, %s33_s21  }
  0x12   : > { %p1383_p11 = scmp.ge.s32.totalorder %s1542_s17, 6 }
  0x14   : > { %120 = sbr.rel (%p1383_p11) target bundleno = 55 (0x37), region = 16 }
  0x1b   : > { %123 = sbr.rel (!%p1620_p4) target bundleno = 48 (0x30), region = 20  ;;  %s125_s3 = sand.u32 (%p1620_p4), 1, %s1522_s12  }
  0x1c   : > { %s1391_s4 = smul.u32 (%p1620_p4), 84, %s1534_s15 }
  0x1d   : > { %s1390_s5 = smul.u32 (%p1620_p4), 224, %s125_s3 }
  0x1e   : > { %s129_s6 = sadd.s32 (%p1620_p4), %s1538_s16, %s1391_s4 }
  0x1f   : > { %s1384_s7 = sshll.u32 (%p1620_p4), %s129_s6, 3  ;;  %s1662_s21 = scalar_lea.vmem (%p1620_p4), [#allocation3], %s1390_s5 }
  0x20   : > { %s1657_s22 = scalar_lea.vmem (%p1620_p4), %s2533_s0, %s1384_s7 }
  0x21   : > { %v213_v0 = vld [vmem:[%s1657_s22] sm:$0xff] (%p1620_p4)  ;;  %v215_v1 = vld [vmem:[%s1657_s22 + $0x18] sm:$0xff] (%p1620_p4)  ;;  %v217_v2 = vld [vmem:[%s1657_s22 + $0x30] sm:$0xff] (%p1620_p4) }
  0x22   : > { %214 = vst [vmem:[%s1662_s21] sm:$0xff] %v213_v0  ;;  %216 = vst [vmem:[%s1662_s21 + $0x8] sm:$0xff] %v215_v1  ;;  %v219_v3 = vld [vmem:[%s1657_s22 + $0x48] sm:$0xff]  ;;  %v221_v4 = vld [vmem:[%s1657_s22 + $0x60] sm:$0xff] }
  0x23   : > { %218 = vst [vmem:[%s1662_s21 + $0x10] sm:$0xff] %v217_v2  ;;  %v223_v5 = vld [vmem:[%s1657_s22 + $0x78] sm:$0xff]  ;;  %220 = vst [vmem:[%s1662_s21 + $0x18] sm:$0xff] %v219_v3  ;;  %v225_v6 = vld [vmem:[%s1657_s22 + $0x90] sm:$0xff] }
  0x24   : > { %222 = vst [vmem:[%s1662_s21 + $0x20] sm:$0xff] %v221_v4  ;;  %224 = vst [vmem:[%s1662_s21 + $0x28] sm:$0xff] %v223_v5  ;;  %v227_v7 = vld [vmem:[%s1657_s22 + $0xa8] sm:$0xff]  ;;  %v229_v8 = vld [vmem:[%s1657_s22 + $0xc0] sm:$0xff] }
  0x25   : > { %226 = vst [vmem:[%s1662_s21 + $0x30] sm:$0xff] %v225_v6  ;;  %228 = vst [vmem:[%s1662_s21 + $0x38] sm:$0xff] %v227_v7  ;;  %v231_v9 = vld [vmem:[%s1657_s22 + $0xd8] sm:$0xff]  ;;  %v233_v10 = vld [vmem:[%s1657_s22 + $0xf0] sm:$0xff] }
  0x26   : > { %230 = vst [vmem:[%s1662_s21 + $0x40] sm:$0xff] %v229_v8  ;;  %v235_v11 = vld [vmem:[%s1657_s22 + $0x108] sm:$0xff]  ;;  %232 = vst [vmem:[%s1662_s21 + $0x48] sm:$0xff] %v231_v9  ;;  %v237_v12 = vld [vmem:[%s1657_s22 + $0x120] sm:$0xff] }
  0x27   : > { %234 = vst [vmem:[%s1662_s21 + $0x50] sm:$0xff] %v233_v10  ;;  %236 = vst [vmem:[%s1662_s21 + $0x58] sm:$0xff] %v235_v11  ;;  %v239_v13 = vld [vmem:[%s1657_s22 + $0x138] sm:$0xff]  ;;  %v241_v14 = vld [vmem:[%s1657_s22 + $0x150] sm:$0xff] }
  0x28   : > { %238 = vst [vmem:[%s1662_s21 + $0x60] sm:$0xff] %v237_v12  ;;  %240 = vst [vmem:[%s1662_s21 + $0x68] sm:$0xff] %v239_v13  ;;  %v243_v15 = vld [vmem:[%s1657_s22 + $0x168] sm:$0xff]  ;;  %v245_v16 = vld [vmem:[%s1657_s22 + $0x180] sm:$0xff] }
  0x29   : > { %242 = vst [vmem:[%s1662_s21 + $0x70] sm:$0xff] %v241_v14  ;;  %v247_v17 = vld [vmem:[%s1657_s22 + $0x198] sm:$0xff]  ;;  %244 = vst [vmem:[%s1662_s21 + $0x78] sm:$0xff] %v243_v15  ;;  %v249_v18 = vld [vmem:[%s1657_s22 + $0x1b0] sm:$0xff] }
  0x2a   : > { %246 = vst [vmem:[%s1662_s21 + $0x80] sm:$0xff] %v245_v16  ;;  %248 = vst [vmem:[%s1662_s21 + $0x88] sm:$0xff] %v247_v17  ;;  %v251_v19 = vld [vmem:[%s1657_s22 + $0x1c8] sm:$0xff]  ;;  %v253_v20 = vld [vmem:[%s1657_s22 + $0x1e0] sm:$0xff] }
  0x2b   : > { %250 = vst [vmem:[%s1662_s21 + $0x90] sm:$0xff] %v249_v18  ;;  %252 = vst [vmem:[%s1662_s21 + $0x98] sm:$0xff] %v251_v19  ;;  %v255_v21 = vld [vmem:[%s1657_s22 + $0x1f8] sm:$0xff]  ;;  %v257_v22 = vld [vmem:[%s1657_s22 + $0x210] sm:$0xff] }
  0x2c   : > { %254 = vst [vmem:[%s1662_s21 + $0xa0] sm:$0xff] %v253_v20  ;;  %v259_v23 = vld [vmem:[%s1657_s22 + $0x228] sm:$0xff]  ;;  %256 = vst [vmem:[%s1662_s21 + $0xa8] sm:$0xff] %v255_v21  ;;  %v261_v24 = vld [vmem:[%s1657_s22 + $0x240] sm:$0xff] }
  0x2d   : > { %258 = vst [vmem:[%s1662_s21 + $0xb0] sm:$0xff] %v257_v22  ;;  %260 = vst [vmem:[%s1662_s21 + $0xb8] sm:$0xff] %v259_v23  ;;  %v263_v25 = vld [vmem:[%s1657_s22 + $0x258] sm:$0xff]  ;;  %v265_v26 = vld [vmem:[%s1657_s22 + $0x270] sm:$0xff] }
  0x2e   : > { %262 = vst [vmem:[%s1662_s21 + $0xc0] sm:$0xff] %v261_v24  ;;  %264 = vst [vmem:[%s1662_s21 + $0xc8] sm:$0xff] %v263_v25  ;;  %v267_v27 = vld [vmem:[%s1657_s22 + $0x288] sm:$0xff] }
  0x2f   : > { %266 = vst [vmem:[%s1662_s21 + $0xd0] sm:$0xff] %v265_v26  ;;  %268 = vst [vmem:[%s1662_s21 + $0xd8] sm:$0xff] %v267_v27 }
  0x30 PF: > { %274 = sbr.rel (!%p1628_p6) target bundleno = 55 (0x37), region = 58  ;;  %s276_s23 = sand.u32 (%p1628_p6), 1, %s1514_s10  }
  0x31   : > { %s1385_s25 = sshll.u32 (%p1628_p6), %s1538_s16, 2  ;;  %s1392_s26 = smul.u32 (%p1628_p6), 12, %s276_s23 }
  0x32   : > { %s280_s4 = scalar_lea.vmem (%p1628_p6), %s2534_s1, %s1385_s25 }
  0x33   : > { %v296_v28 = vld [vmem:[%s280_s4] sm:$0xf] (%p1628_p6)  ;;  %v298_v29 = vld [vmem:[%s280_s4 + $0xc] sm:$0xf] (%p1628_p6)  ;;  %v300_v30 = vld [vmem:[%s280_s4 + $0x18] sm:$0xf] (%p1628_p6) }
  0x34   : > { %s278_s5 = scalar_lea.vmem (%p1628_p6), [#allocation4], %s1392_s26 }
  0x35   : > { %297 = vst [vmem:[%s278_s5] sm:$0xf] (%p1628_p6), %v296_v28  ;;  %299 = vst [vmem:[%s278_s5 + $0x4] sm:$0xf] (%p1628_p6), %v298_v29 }
  0x36   : > { %301 = vst [vmem:[%s278_s5 + $0x8] sm:$0xf] (%p1628_p6), %v300_v30 }
  0x37 PF: > { %p1386_p12 = scmp.ge.s32.totalorder %s1542_s17, 1  ;;  %p329_p13 = scmp.lt.s32.totalorder %s1542_s17, 7 }
  0x39   : > { %p330_p0 = pnand %p1386_p12, %p329_p13 }
  0x3a   : > { %s336_s24 = sand.u32 (!%p330_p0), 1, %s1518_s11   ;;  %v1544_v31 = vmov (!%p330_p0), 0.0   ;;  %v507_v32 = vlaneseq (!%p330_p0)  ;;  %s343_s7 = sand.u32 (!%p330_p0), 1, %s1510_s9  }
  0x3b   : > { %333 = sbr.rel (%p330_p0) target bundleno = 220 (0xdc), region = 99  ;;  %370 = vst [vmem:[#allocation2] sm:$0xff] (!%p330_p0), %v1544_v31  ;;  %371 = vst [vmem:[#allocation2 + $0x8] sm:$0xff] (!%p330_p0), %v1544_v31 }
  0x3c   : > { %372 = vst [vmem:[#allocation2 + $0x10] sm:$0xff] (!%p330_p0), %v1544_v31  ;;  %373 = vst [vmem:[#allocation2 + $0x18] sm:$0xff] (!%p330_p0), %v1544_v31  ;;  %s1729_s6 = smul.u32 (!%p330_p0), 224, %s336_s24  ;;  %v508_v42 = vshrl.u32 (!%p330_p0), %v507_v32, 7 }
  0x3d   : > { %375 = vst [vmem:[#allocation2 + $0x28] sm:$0xff] (!%p330_p0), %v1544_v31  ;;  %376 = vst [vmem:[#allocation2 + $0x30] sm:$0xff] (!%p330_p0), %v1544_v31  ;;  %s1757_s9 = smul.u32 (!%p330_p0), 12, %s343_s7 }
  0x3e   : > { %378 = vst [vmem:[#allocation2 + $0x40] sm:$0xff] (!%p330_p0), %v1544_v31  ;;  %379 = vst [vmem:[#allocation2 + $0x48] sm:$0xff] (!%p330_p0), %v1544_v31  ;;  %s1733_s8 = scalar_lea.vmem (!%p330_p0), [#allocation3], %s1729_s6  ;;  %v509_v55 = vsub.s32 (!%p330_p0), 0, %v508_v42  ;;  %v721_v59 = vsub.s32 (!%p330_p0), 1, %v508_v42  ;;  %v933_v63 = vsub.s32 (!%p330_p0), 2, %v508_v42 }
  0x3f   : > { %381 = vst [vmem:[#allocation2 + $0x58] sm:$0xff] (!%p330_p0), %v1544_v31  ;;  %382 = vst [vmem:[#allocation2 + $0x60] sm:$0xff] (!%p330_p0), %v1544_v31  ;;  %v1736_v33 = vld [vmem:[%s1733_s8] sm:$0xff] (!%p330_p0)  ;;  %v419_v34 = vld [vmem:[%s1733_s8 + $0x8] sm:$0x3f] (!%p330_p0)  ;;  %s345_s11 = scalar_lea.vmem (!%p330_p0), [#allocation4], %s1757_s9 }
  0x40   : > { %384 = vst [vmem:[#allocation2 + $0x70] sm:$0xff] (!%p330_p0), %v1544_v31  ;;  %385 = vst [vmem:[#allocation2 + $0x78] sm:$0xff] (!%p330_p0), %v1544_v31  ;;  %v1740_v35 = vld [vmem:[%s1733_s8 + $0x10] sm:$0xff] (!%p330_p0)  ;;  %v421_v36 = vld [vmem:[%s1733_s8 + $0x18] sm:$0x3f] (!%p330_p0)  ;;  %s1907_s20 = scalar_lea.vmem (!%p330_p0), [#allocation5], %s1729_s6 }
  0x41   : > { %387 = vst [vmem:[#allocation2 + $0x88] sm:$0xff] (!%p330_p0), %v1544_v31  ;;  %388 = vst [vmem:[#allocation2 + $0x90] sm:$0xff] (!%p330_p0), %v1544_v31  ;;  %v1746_v37 = vld [vmem:[%s1733_s8 + $0x20] sm:$0xff] (!%p330_p0)  ;;  %v423_v38 = vld [vmem:[%s1733_s8 + $0x28] sm:$0x3f] (!%p330_p0) }
  0x42   : > { %390 = vst [vmem:[#allocation2 + $0xa0] sm:$0xff] %v1544_v31  ;;  %391 = vst [vmem:[#allocation2 + $0xa8] sm:$0xff] %v1544_v31  ;;  %v1751_v39 = vld [vmem:[%s1733_s8 + $0x30] sm:$0xff]  ;;  %v425_v40 = vld [vmem:[%s1733_s8 + $0x38] sm:$0x3f]  ;;  %s1395_s22 = smul.u32 (%p1638_p10), 84, %s1526_s13 }
  0x43   : > { %393 = vst [vmem:[#allocation2 + $0xb8] sm:$0xff] %v1544_v31  ;;  %394 = vst [vmem:[#allocation2 + $0xc0] sm:$0xff] %v1544_v31  ;;  %v1755_v41 = vld [vmem:[%s1733_s8 + $0x40] sm:$0xff]  ;;  %v427_v43 = vld [vmem:[%s1733_s8 + $0x48] sm:$0x3f] }
  0x44   : > { %396 = vst [vmem:[#allocation2 + $0xd0] sm:$0xff] %v1544_v31  ;;  %397 = vst [vmem:[#allocation2 + $0xd8] sm:$0xff] %v1544_v31  ;;  %v1763_v44 = vld [vmem:[%s1733_s8 + $0x50] sm:$0xff]  ;;  %v429_v45 = vld [vmem:[%s1733_s8 + $0x58] sm:$0x3f]  ;;  %s1147_s28 = sadd.s32 (%p1638_p10), %s1530_s14, %s1395_s22 }
  0x45   : > { %399 = vst [vmem:[#allocation2 + $0xe8] sm:$0xff] %v1544_v31  ;;  %400 = vst [vmem:[#allocation2 + $0xf0] sm:$0xff] %v1544_v31  ;;  %v1768_v46 = vld [vmem:[%s1733_s8 + $0x60] sm:$0xff]  ;;  %v431_v47 = vld [vmem:[%s1733_s8 + $0x68] sm:$0x3f]  ;;  %s1387_s21 = sshll.u32 (%p1638_p10), %s1147_s28, 3 }
  0x46   : > { %402 = vst [vmem:[#allocation2 + $0x100] sm:$0xff] %v1544_v31  ;;  %403 = vst [vmem:[#allocation2 + $0x108] sm:$0xff] %v1544_v31  ;;  %v1772_v48 = vld [vmem:[%s1733_s8 + $0x70] sm:$0xff]  ;;  %v433_v49 = vld [vmem:[%s1733_s8 + $0x78] sm:$0x3f]  ;;  %s2460_s13 = scalar_lea.vmem (%p1638_p10), %s2535_s2, %s1387_s21 }
  0x47   : > { %405 = vst [vmem:[#allocation2 + $0x118] sm:$0xff] %v1544_v31  ;;  %406 = vst [vmem:[#allocation2 + $0x120] sm:$0xff] %v1544_v31  ;;  %v1778_v50 = vld [vmem:[%s1733_s8 + $0x80] sm:$0xff]  ;;  %v435_v51 = vld [vmem:[%s1733_s8 + $0x88] sm:$0x3f] }
  0x48   : > { %408 = vst [vmem:[#allocation2 + $0x130] sm:$0xff] %v1544_v31  ;;  %409 = vst [vmem:[#allocation2 + $0x138] sm:$0xff] %v1544_v31  ;;  %v1783_v52 = vld [vmem:[%s1733_s8 + $0x90] sm:$0xff]  ;;  %v437_v53 = vld [vmem:[%s1733_s8 + $0x98] sm:$0x3f] }
  0x49   : > { %411 = vst [vmem:[#allocation2 + $0x148] sm:$0xff] %v1544_v31  ;;  %412 = vst [vmem:[#allocation2 + $0x150] sm:$0xff] %v1544_v31  ;;  %v1787_v54 = vld [vmem:[%s1733_s8 + $0xa0] sm:$0xff]  ;;  %v439_v56 = vld [vmem:[%s1733_s8 + $0xa8] sm:$0x3f] }
  0x4a   : > { %414 = vst [vmem:[#allocation2 + $0x160] sm:$0xff] %v1544_v31  ;;  %415 = vst [vmem:[#allocation2 + $0x168] sm:$0xff] %v1544_v31  ;;  %v1793_v57 = vld [vmem:[%s1733_s8 + $0xb0] sm:$0xff]  ;;  %v441_v58 = vld [vmem:[%s1733_s8 + $0xb8] sm:$0x3f] }
  0x4b   : > { %416 = vst [vmem:[#allocation2 + $0x170] sm:$0xff] %v1544_v31  ;;  %417 = vst [vmem:[#allocation2 + $0x178] sm:$0xff] %v1544_v31  ;;  %v1798_v60 = vld [vmem:[%s1733_s8 + $0xc0] sm:$0xff]  ;;  %v443_v61 = vld [vmem:[%s1733_s8 + $0xc8] sm:$0x3f] }
  0x4c   : > { %447 = vst [vmem:[#allocation2 + $0x20] sm:$0xff] %v1736_v33  ;;  %448 = vst [vmem:[#allocation2 + $0x28] sm:$0x3f] %v419_v34  ;;  %v444_v62 = vld [vmem:[%s1733_s8 + $0xd0] sm:$0xff]  ;;  %v445_v0 = vld [vmem:[%s1733_s8 + $0xd8] sm:$0x3f] }
  0x4d   : > { %449 = vst [vmem:[#allocation2 + $0x38] sm:$0xff] %v1740_v35  ;;  %450 = vst [vmem:[#allocation2 + $0x40] sm:$0x3f] %v421_v36  ;;  %v367_v1 = vld [vmem:[%s345_s11] sm:$0x7] }
  0x4e   : > { %451 = vst [vmem:[#allocation2 + $0x50] sm:$0xff] %v1746_v37  ;;  %452 = vst [vmem:[#allocation2 + $0x58] sm:$0x3f] %v423_v38  ;;  %v368_v2 = vld [vmem:[%s345_s11 + $0x4] sm:$0x7]  ;;  %v475_v4 = vld [vmem:[#allocation2 + $0x7] sm:$0xff]  ;;  %v1805_v6 = vrot.slane %v367_v1, %v509_v55  ;;  %v1813_v10 = vrot.slane %v367_v1, %v721_v59  ;;  %v1817_v13 = vrot.slane %v367_v1, %v933_v63 }
  0x4f   : > { %453 = vst [vmem:[#allocation2 + $0x68] sm:$0xff] %v1751_v39  ;;  %454 = vst [vmem:[#allocation2 + $0x70] sm:$0x3f] %v425_v40  ;;  %v369_v3 = vld [vmem:[%s345_s11 + $0x8] sm:$0x7]  ;;  %v1807_v7 = vrot.slane %v368_v2, %v509_v55  ;;  %v1820_v17 = vrot.slane %v368_v2, %v721_v59  ;;  %v1824_v20 = vrot.slane %v368_v2, %v933_v63 }
  0x50   : > { %455 = vst [vmem:[#allocation2 + $0x80] sm:$0xff] %v1755_v41  ;;  %456 = vst [vmem:[#allocation2 + $0x88] sm:$0x3f] %v427_v43  ;;  %v1811_v9 = vrot.slane %v369_v3, %v509_v55  ;;  %v511_v11 = vmul.f32 %v1805_v6, %v475_v4  ;;  %v476_v14 = vld [vmem:[#allocation2 + $0xf] sm:$0x3f]  ;;  %v723_v16 = vmul.f32 0.0, %v1813_v10  ;;  %v1822_v18 = vrot.slane %v369_v3, %v721_v59 }
  0x51   : > { %457 = vst [vmem:[#allocation2 + $0x98] sm:$0xff] %v1763_v44  ;;  %458 = vst [vmem:[#allocation2 + $0xa0] sm:$0x3f] %v429_v45  ;;  %v899_v19 = vld [vmem:[#allocation2 + $0x9] sm:$0xff]  ;;  %v512_v25 = vmul.f32 %v1805_v6, %v476_v14  ;;  %v783_v28 = vmul.f32 %v1820_v17, %v1736_v33  ;;  %v1836_v30 = vrot.slane %v369_v3, %v933_v63 }
  0x52   : > { %459 = vst [vmem:[#allocation2 + $0xb0] sm:$0xff] %v1768_v46  ;;  %460 = vst [vmem:[#allocation2 + $0xb8] sm:$0x3f] %v431_v47  ;;  %v688_v27 = vld [vmem:[#allocation2 + $0x10] sm:$0x3f]  ;;  %v843_v29 = vmul.f32 %v1822_v18, %v1740_v35  ;;  %v935_v38 = vmul.f32 %v1817_v13, %v899_v19  ;;  %v725_v2 = vmul.f32 %v1813_v10, %v1736_v33 }
  0x53   : > { %461 = vst [vmem:[#allocation2 + $0xc8] sm:$0xff] %v1772_v48  ;;  %462 = vst [vmem:[#allocation2 + $0xd0] sm:$0x3f] %v433_v49  ;;  %v477_v5 = vld [vmem:[#allocation2 + $0x1f] sm:$0xff]  ;;  %v478_v15 = vld [vmem:[#allocation2 + $0x27] sm:$0x3f]  ;;  %v724_v47 = vmul.f32 %v1813_v10, %v688_v27 }
  0x54   : > { %463 = vst [vmem:[#allocation2 + $0xe0] sm:$0xff] %v1778_v50  ;;  %464 = vst [vmem:[#allocation2 + $0xe8] sm:$0x3f] %v435_v51  ;;  %v1809_v8 = vld [vmem:[#allocation2 + $0x37] sm:$0xff]  ;;  %v571_v12 = vmul.f32 %v1807_v7, %v477_v5  ;;  %v1826_v21 = vld [vmem:[#allocation2 + $0x3f] sm:$0x3f]  ;;  %v572_v26 = vmul.f32 %v1807_v7, %v478_v15  ;;  %v514_v19 = vmul.f32 %v1805_v6, %v478_v15 }
  0x55   : > { %465 = vst [vmem:[#allocation2 + $0xf8] sm:$0xff] %v1783_v52  ;;  %466 = vst [vmem:[#allocation2 + $0x100] sm:$0x3f] %v437_v53  ;;  %v631_v23 = vmul.f32 %v1811_v9, %v1809_v8  ;;  %v901_v24 = vld [vmem:[#allocation2 + $0x21] sm:$0xff]  ;;  %v1840_v36 = vld [vmem:[#allocation2 + $0x39] sm:$0xff]  ;;  %v632_v42 = vmul.f32 %v1811_v9, %v1826_v21  ;;  %v513_v53 = vmul.f32 %v1805_v6, %v477_v5 }
  0x56   : > { %467 = vst [vmem:[#allocation2 + $0x110] sm:$0xff] %v1787_v54  ;;  %468 = vst [vmem:[#allocation2 + $0x118] sm:$0x3f] %v439_v56  ;;  %v599_v22 = vadd.f32 %v571_v12, %v511_v11  ;;  %v690_v31 = vld [vmem:[#allocation2 + $0x28] sm:$0x3f]  ;;  %v600_v40 = vadd.f32 %v572_v26, %v512_v25  ;;  %v1845_v43 = vld [vmem:[#allocation2 + $0x4f] sm:$0xff]  ;;  %v995_v45 = vmul.f32 %v1824_v20, %v901_v24 }
  0x57   : > { %469 = vst [vmem:[#allocation2 + $0x128] sm:$0xff] %v1793_v57  ;;  %470 = vst [vmem:[#allocation2 + $0x130] sm:$0x3f] %v441_v58  ;;  %v1838_v32 = vld [vmem:[#allocation2 + $0x40] sm:$0x3f]  ;;  %v573_v55 = vmul.f32 %v1807_v7, %v1809_v8  ;;  %v784_v59 = vmul.f32 %v1820_v17, %v690_v31  ;;  %v633_v1 = vmul.f32 %v1811_v9, %v1845_v43 }
  0x58   : > { %471 = vst [vmem:[#allocation2 + $0x140] sm:$0xff] %v1798_v60  ;;  %472 = vst [vmem:[#allocation2 + $0x148] sm:$0x3f] %v443_v61  ;;  %v659_v34 = vadd.f32 %v631_v23, %v599_v22  ;;  %v900_v49 = vld [vmem:[#allocation2 + $0x11] sm:$0x3f]  ;;  %v660_v58 = vadd.f32 %v632_v42, %v600_v40  ;;  %v844_v61 = vmul.f32 %v1822_v18, %v1838_v32  ;;  %v1879_v42 = vld [vmem:[#allocation2 + $0x67] sm:$0xff] }
  0x59   : > { %473 = vst [vmem:[#allocation2 + $0x158] sm:$0xff] %v444_v62  ;;  %474 = vst [vmem:[#allocation2 + $0x160] sm:$0x3f] %v445_v0  ;;  %v902_v51 = vld [vmem:[#allocation2 + $0x29] sm:$0x3f]  ;;  %v1055_v62 = vmul.f32 %v1836_v30, %v1840_v36  ;;  %v601_v0 = vadd.f32 %v573_v55, %v513_v53  ;;  %v936_v5 = vmul.f32 %v1817_v13, %v900_v49  ;;  %v1884_v55 = vld [vmem:[#allocation2 + $0x51] sm:$0xff] }
  0x5a   : > { %v751_v56 = vadd.f32 %v723_v16, %v659_v34  ;;  %v1857_v63 = vld [vmem:[#allocation2 + $0x41] sm:$0x3f]  ;;  %v752_v4 = vadd.f32 %v724_v47, %v660_v58  ;;  %v996_v11 = vmul.f32 %v1824_v20, %v902_v51  ;;  %v1865_v12 = vld [vmem:[#allocation2 + $0x57] sm:$0x3f]  ;;  %v785_v16 = vmul.f32 %v1820_v17, %v1740_v35 }
  0x5b   : > { %v661_v14 = vadd.f32 %v633_v1, %v601_v0  ;;  %v574_v22 = vmul.f32 %v1807_v7, %v1826_v21  ;;  %v1056_v33 = vmul.f32 %v1836_v30, %v1857_v63  ;;  %v845_v26 = vmul.f32 %v1822_v18, %v1746_v37  ;;  %v1886_v58 = vld [vmem:[#allocation2 + $0x58] sm:$0x3f] }
  0x5c   : > { %v811_v3 = vadd.f32 %v783_v28, %v751_v56  ;;  %v812_v25 = vadd.f32 %v784_v59, %v752_v4  ;;  %v937_v28 = vmul.f32 %v1817_v13, %v901_v24  ;;  %v634_v40 = vmul.f32 %v1811_v9, %v1865_v12 }
  0x5d   : > { %v753_v27 = vadd.f32 %v725_v2, %v661_v14  ;;  %v602_v34 = vadd.f32 %v574_v22, %v514_v19  ;;  %v726_v49 = vmul.f32 %v1813_v10, %v690_v31  ;;  %v515_v24 = vmul.f32 %v1805_v6, %v1809_v8 }
  0x5e   : > { %v871_v23 = vadd.f32 %v843_v29, %v811_v3  ;;  %v872_v47 = vadd.f32 %v844_v61, %v812_v25  ;;  %v997_v29 = vmul.f32 %v1824_v20, %v1840_v36  ;;  %v575_v59 = vmul.f32 %v1807_v7, %v1845_v43  ;;  %v1904_v25 = vld [vmem:[#allocation2 + $0x6f] sm:$0x3f] }
  0x5f   : > { %v813_v53 = vadd.f32 %v785_v16, %v753_v27  ;;  %v662_v56 = vadd.f32 %v634_v40, %v602_v34  ;;  %v786_v61 = vmul.f32 %v1820_v17, %v1838_v32  ;;  %v635_v31 = vmul.f32 %v1811_v9, %v1879_v42  ;;  %v1915_v34 = vld [vmem:[#allocation2 + $0x59] sm:$0x3f] }
  0x60   : > { %v963_v15 = vadd.f32 %v935_v38, %v871_v23  ;;  %v964_v38 = vadd.f32 %v936_v5, %v872_v47  ;;  %v603_v3 = vadd.f32 %v575_v59, %v515_v24  ;;  %v727_v4 = vmul.f32 %v1813_v10, %v1740_v35 }
  0x61   : > { %v873_v1 = vadd.f32 %v845_v26, %v813_v53  ;;  %v754_v2 = vadd.f32 %v726_v49, %v662_v56  ;;  %v1057_v16 = vmul.f32 %v1836_v30, %v1884_v55  ;;  %v787_v23 = vmul.f32 %v1820_v17, %v1746_v37 }
  0x62   : > { %v1023_v0 = vadd.f32 %v995_v45, %v963_v15  ;;  %v1024_v8 = vadd.f32 %v996_v11, %v964_v38  ;;  %v846_v45 = vmul.f32 %v1822_v18, %v1886_v58  ;;  %v663_v22 = vadd.f32 %v635_v31, %v603_v3  ;;  %v1933_v31 = vld [vmem:[#allocation2 + $0x69] sm:$0xff] }
  0x63   : > { %v965_v5 = vadd.f32 %v937_v28, %v873_v1  ;;  %v814_v19 = vadd.f32 %v786_v61, %v754_v2  ;;  %v516_v11 = vmul.f32 %v1805_v6, %v1826_v21  ;;  %v576_v26 = vmul.f32 %v1807_v7, %v1865_v12  ;;  %v1937_v2 = vld [vmem:[#allocation2 + $0x70] sm:$0x3f] }
  0x64   : > { %v1083_v14 = vadd.f32 %v1055_v62, %v1023_v0  ;;  %v1084_v35 = vadd.f32 %v1056_v33, %v1024_v8  ;;  %v938_v62 = vmul.f32 %v1817_v13, %v902_v51  ;;  %v755_v40 = vadd.f32 %v727_v4, %v663_v22 }
  0x65   : > { %v1025_v27 = vadd.f32 %v997_v29, %v965_v5  ;;  %v874_v28 = vadd.f32 %v846_v45, %v814_v19  ;;  %v847_v15 = vmul.f32 %v1822_v18, %v1751_v39  ;;  %v604_v47 = vadd.f32 %v576_v26, %v516_v11  ;;  %v1924_v29 = vld [vmem:[#allocation2 + $0x7f] sm:$0xff]  ;;  %v1958_v11 = vld [vmem:[#allocation2 + $0x71] sm:$0x3f] }
  0x66   : > { %1111 = vst [vmem:[%s1907_s20] sm:$0xff] %v1083_v14  ;;  %1112 = vst [vmem:[%s1907_s20 + $0x8] sm:$0x3f] %v1084_v35  ;;  %v636_v51 = vmul.f32 %v1811_v9, %v1904_v25  ;;  %v998_v21 = vmul.f32 %v1824_v20, %v1857_v63  ;;  %v815_v53 = vadd.f32 %v787_v23, %v755_v40  ;;  %v1953_v23 = vld [vmem:[#allocation2 + $0x87] sm:$0x3f] }
  0x67   : > { %v1085_v33 = vadd.f32 %v1057_v16, %v1025_v27  ;;  %v966_v49 = vadd.f32 %v938_v62, %v874_v28  ;;  %v1058_v56 = vmul.f32 %v1836_v30, %v1915_v34  ;;  %v728_v59 = vmul.f32 %v1813_v10, %v1838_v32 }
  0x68   : > { %v664_v24 = vadd.f32 %v636_v51, %v604_v47  ;;  %v517_v0 = vmul.f32 %v1805_v6, %v1845_v43  ;;  %v875_v61 = vadd.f32 %v847_v15, %v815_v53  ;;  %v939_v1 = vmul.f32 %v1817_v13, %v1840_v36 }
  0x69   : > { %1113 = vst [vmem:[%s1907_s20 + $0x10] sm:$0xff] %v1085_v33  ;;  %v1026_v38 = vadd.f32 %v998_v21, %v966_v49  ;;  %v577_v3 = vmul.f32 %v1807_v7, %v1879_v42  ;;  %v999_v32 = vmul.f32 %v1824_v20, %v1884_v55  ;;  %v788_v43 = vmul.f32 %v1820_v17, %v1886_v58  ;;  %v1972_v21 = vld [vmem:[#allocation2 + $0x97] sm:$0xff] }
  0x6a   : > { %v756_v4 = vadd.f32 %v728_v59, %v664_v24  ;;  %v637_v14 = vmul.f32 %v1811_v9, %v1924_v29  ;;  %v967_v16 = vadd.f32 %v939_v1, %v875_v61  ;;  %v729_v36 = vmul.f32 %v1813_v10, %v1746_v37 }
  0x6b   : > { %v1086_v8 = vadd.f32 %v1058_v56, %v1026_v38  ;;  %v605_v45 = vadd.f32 %v577_v3, %v517_v0  ;;  %v1059_v5 = vmul.f32 %v1836_v30, %v1933_v31  ;;  %v848_v22 = vmul.f32 %v1822_v18, %v1937_v2  ;;  %v1981_v38 = vld [vmem:[#allocation2 + $0x88] sm:$0x3f] }
  0x6c   : > { %v816_v19 = vadd.f32 %v788_v43, %v756_v4  ;;  %v518_v35 = vmul.f32 %v1805_v6, %v1865_v12  ;;  %v1027_v62 = vadd.f32 %v999_v32, %v967_v16  ;;  %v789_v37 = vmul.f32 %v1820_v17, %v1751_v39  ;;  %v1993_v43 = vld [vmem:[#allocation2 + $0x81] sm:$0xff] }
  0x6d   : > { %1114 = vst [vmem:[%s1907_s20 + $0x18] sm:$0x3f] %v1086_v8  ;;  %v665_v26 = vadd.f32 %v637_v14, %v605_v45  ;;  %v578_v27 = vmul.f32 %v1807_v7, %v1904_v25  ;;  %v940_v40 = vmul.f32 %v1817_v13, %v1857_v63  ;;  %v1000_v15 = vmul.f32 %v1824_v20, %v1915_v34  ;;  %v1997_v16 = vld [vmem:[#allocation2 + $0x9f] sm:$0x3f] }
  0x6e   : > { %v876_v28 = vadd.f32 %v848_v22, %v816_v19  ;;  %v849_v12 = vmul.f32 %v1822_v18, %v1755_v41  ;;  %v1087_v47 = vadd.f32 %v1059_v5, %v1027_v62  ;;  %v638_v49 = vmul.f32 %v1811_v9, %v1953_v23  ;;  %v2005_v62 = vld [vmem:[#allocation2 + $0x89] sm:$0x3f] }
  0x6f   : > { %v757_v51 = vadd.f32 %v729_v36, %v665_v26  ;;  %v606_v33 = vadd.f32 %v578_v27, %v518_v35  ;;  %v1060_v56 = vmul.f32 %v1836_v30, %v1958_v11  ;;  %v941_v63 = vmul.f32 %v1817_v13, %v1884_v55 }
  0x70   : > { %v968_v53 = vadd.f32 %v940_v40, %v876_v28  ;;  %v519_v24 = vmul.f32 %v1805_v6, %v1879_v42  ;;  %1115 = vst [vmem:[%s1907_s20 + $0x20] sm:$0xff] %v1087_v47  ;;  %v730_v61 = vmul.f32 %v1813_v10, %v1886_v58  ;;  %v579_v1 = vmul.f32 %v1807_v7, %v1924_v29  ;;  %v2018_v47 = vld [vmem:[#allocation2 + $0x99] sm:$0xff] }
  0x71   : > { %v817_v59 = vadd.f32 %v789_v37, %v757_v51  ;;  %v666_v0 = vadd.f32 %v638_v49, %v606_v33  ;;  %v1001_v32 = vmul.f32 %v1824_v20, %v1933_v31  ;;  %v790_v55 = vmul.f32 %v1820_v17, %v1937_v2 }
  0x72   : > { %v1028_v3 = vadd.f32 %v1000_v15, %v968_v53  ;;  %v639_v42 = vmul.f32 %v1811_v9, %v1972_v21  ;;  %v607_v8 = vadd.f32 %v579_v1, %v519_v24  ;;  %v731_v58 = vmul.f32 %v1813_v10, %v1751_v39 }
  0x73   : > { %v877_v4 = vadd.f32 %v849_v12, %v817_v59  ;;  %v758_v14 = vadd.f32 %v730_v61, %v666_v0  ;;  %v850_v36 = vmul.f32 %v1822_v18, %v1981_v38  ;;  %v791_v5 = vmul.f32 %v1820_v17, %v1755_v41  ;;  %v2028_v0 = vld [vmem:[#allocation2 + $0xa0] sm:$0x3f]  ;;  %v2030_v61 = vld [vmem:[#allocation2 + $0xaf] sm:$0xff] }
  0x74   : > { %v1088_v45 = vadd.f32 %v1060_v56, %v1028_v3  ;;  %v520_v19 = vmul.f32 %v1805_v6, %v1904_v25  ;;  %v667_v26 = vadd.f32 %v639_v42, %v607_v8  ;;  %v580_v39 = vmul.f32 %v1807_v7, %v1953_v23 }
  0x75   : > { %v969_v22 = vadd.f32 %v941_v63, %v877_v4  ;;  %v818_v35 = vadd.f32 %v790_v55, %v758_v14  ;;  %v1061_v37 = vmul.f32 %v1836_v30, %v1993_v43  ;;  %v942_v27 = vmul.f32 %v1817_v13, %v1915_v34  ;;  %v2045_v14 = vld [vmem:[#allocation2 + $0xa1] sm:$0x3f] }
  0x76   : > { %1116 = vst [vmem:[%s1907_s20 + $0x28] sm:$0x3f] %v1088_v45  ;;  %v851_v28 = vmul.f32 %v1822_v18, %v1763_v44  ;;  %v640_v25 = vmul.f32 %v1811_v9, %v1997_v16  ;;  %v759_v12 = vadd.f32 %v731_v58, %v667_v26  ;;  %v608_v51 = vadd.f32 %v580_v39, %v520_v19 }
  0x77   : > { %v1029_v40 = vadd.f32 %v1001_v32, %v969_v22  ;;  %v878_v15 = vadd.f32 %v850_v36, %v818_v35  ;;  %v1002_v33 = vmul.f32 %v1824_v20, %v1958_v11  ;;  %v1062_v49 = vmul.f32 %v1836_v30, %v2005_v62  ;;  %v2051_v22 = vld [vmem:[#allocation2 + $0xb7] sm:$0x3f] }
  0x78   : > { %v732_v34 = vmul.f32 %v1813_v10, %v1937_v2  ;;  %v521_v53 = vmul.f32 %v1805_v6, %v1924_v29  ;;  %v819_v24 = vadd.f32 %v791_v5, %v759_v12  ;;  %v668_v59 = vadd.f32 %v640_v25, %v608_v51  ;;  %v2070_v51 = vld [vmem:[#allocation2 + $0xc7] sm:$0xff] }
  0x79   : > { %v1089_v56 = vadd.f32 %v1061_v37, %v1029_v40  ;;  %v970_v63 = vadd.f32 %v942_v27, %v878_v15  ;;  %v943_v1 = vmul.f32 %v1817_v13, %v1933_v31  ;;  %v1003_v3 = vmul.f32 %v1824_v20, %v1993_v43 }
  0x7a   : > { %v1063_v2 = vmul.f32 %v1836_v30, %v2018_v47  ;;  %v581_v29 = vmul.f32 %v1807_v7, %v1972_v21  ;;  %v879_v55 = vadd.f32 %v851_v28, %v819_v24  ;;  %v760_v42 = vadd.f32 %v732_v34, %v668_v59  ;;  %v2076_v24 = vld [vmem:[#allocation2 + $0xb8] sm:$0x3f] }
  0x7b   : > { %1117 = vst [vmem:[%s1907_s20 + $0x30] sm:$0xff] %v1089_v56  ;;  %v1030_v32 = vadd.f32 %v1002_v33, %v970_v63  ;;  %v792_v4 = vmul.f32 %v1820_v17, %v1981_v38  ;;  %v852_v31 = vmul.f32 %v1822_v18, %v2028_v0  ;;  %v641_v58 = vmul.f32 %v1811_v9, %v2030_v61 }
  0x7c   : > { %v609_v8 = vadd.f32 %v581_v29, %v521_v53  ;;  %v733_v45 = vmul.f32 %v1813_v10, %v1755_v41  ;;  %v971_v5 = vadd.f32 %v943_v1, %v879_v55  ;;  %v522_v35 = vmul.f32 %v1805_v6, %v1953_v23 }
  0x7d   : > { %v1090_v36 = vadd.f32 %v1062_v49, %v1030_v32  ;;  %v820_v19 = vadd.f32 %v792_v4, %v760_v42  ;;  %v944_v26 = vmul.f32 %v1817_v13, %v1958_v11  ;;  %v793_v37 = vmul.f32 %v1820_v17, %v1763_v44  ;;  %v2089_v32 = vld [vmem:[#allocation2 + $0xb1] sm:$0xff] }
  0x7e   : > { %v669_v39 = vadd.f32 %v641_v58, %v609_v8  ;;  %v582_v27 = vmul.f32 %v1807_v7, %v1997_v16  ;;  %v1031_v41 = vadd.f32 %v1003_v3, %v971_v5  ;;  %v1004_v25 = vmul.f32 %v1824_v20, %v2005_v62  ;;  %v2093_v4 = vld [vmem:[#allocation2 + $0xcf] sm:$0x3f] }
  0x7f   : > { %1118 = vst [vmem:[%s1907_s20 + $0x38] sm:$0x3f] %v1090_v36  ;;  %v880_v28 = vadd.f32 %v852_v31, %v820_v19  ;;  %v1064_v23 = vmul.f32 %v1836_v30, %v2045_v14  ;;  %v853_v11 = vmul.f32 %v1822_v18, %v1768_v46  ;;  %v642_v12 = vmul.f32 %v1811_v9, %v2051_v22  ;;  %v2101_v19 = vld [vmem:[#allocation2 + $0xb9] sm:$0x3f] }
  0x80   : > { %v761_v40 = vadd.f32 %v733_v45, %v669_v39  ;;  %v610_v15 = vadd.f32 %v582_v27, %v522_v35  ;;  %v1091_v33 = vadd.f32 %v1063_v2, %v1031_v41  ;;  %v945_v34 = vmul.f32 %v1817_v13, %v1993_v43 }
  0x81   : > { %v972_v49 = vadd.f32 %v944_v26, %v880_v28  ;;  %v523_v53 = vmul.f32 %v1805_v6, %v1972_v21  ;;  %v734_v59 = vmul.f32 %v1813_v10, %v1981_v38  ;;  %v583_v1 = vmul.f32 %v1807_v7, %v2030_v61 }
  0x82   : > { %v821_v56 = vadd.f32 %v793_v37, %v761_v40  ;;  %v670_v63 = vadd.f32 %v642_v12, %v610_v15  ;;  %1119 = vst [vmem:[%s1907_s20 + $0x40] sm:$0xff] %v1091_v33  ;;  %v1005_v2 = vmul.f32 %v1824_v20, %v2018_v47  ;;  %v794_v43 = vmul.f32 %v1820_v17, %v2028_v0 }
  0x83   : > { %v1032_v3 = vadd.f32 %v1004_v25, %v972_v49  ;;  %v643_v21 = vmul.f32 %v1811_v9, %v2070_v51  ;;  %v611_v38 = vadd.f32 %v583_v1, %v523_v53  ;;  %v735_v42 = vmul.f32 %v1813_v10, %v1763_v44  ;;  %v2114_v25 = vld [vmem:[#allocation2 + $0xc9] sm:$0xff] }
  0x84   : > { %v881_v29 = vadd.f32 %v853_v11, %v821_v56  ;;  %v762_v55 = vadd.f32 %v734_v59, %v670_v63  ;;  %v854_v8 = vmul.f32 %v1822_v18, %v2076_v24  ;;  %v795_v58 = vmul.f32 %v1820_v17, %v1768_v46  ;;  %v2124_v53 = vld [vmem:[#allocation2 + $0xd0] sm:$0x3f]  ;;  %v2126_v56 = vld [vmem:[#allocation2 + $0xdf] sm:$0xff] }
  0x85   : > { %v1092_v31 = vadd.f32 %v1064_v23, %v1032_v3  ;;  %v524_v45 = vmul.f32 %v1805_v6, %v1997_v16  ;;  %v671_v35 = vadd.f32 %v643_v21, %v611_v38  ;;  %v584_v44 = vmul.f32 %v1807_v7, %v2051_v22  ;;  %v2141_v21 = vld [vmem:[#allocation2 + $0xd1] sm:$0x3f] }
  0x86   : > { %v973_v36 = vadd.f32 %v945_v34, %v881_v29  ;;  %v822_v5 = vadd.f32 %v794_v43, %v762_v55  ;;  %v1065_v26 = vmul.f32 %v1836_v30, %v2089_v32  ;;  %v946_v39 = vmul.f32 %v1817_v13, %v2005_v62 }
  0x87   : > { %1120 = vst [vmem:[%s1907_s20 + $0x48] sm:$0x3f] %v1092_v31  ;;  %v855_v37 = vmul.f32 %v1822_v18, %v1772_v48  ;;  %v644_v16 = vmul.f32 %v1811_v9, %v2093_v4  ;;  %v763_v28 = vadd.f32 %v735_v42, %v671_v35  ;;  %v612_v23 = vadd.f32 %v584_v44, %v524_v45 }
  0x88   : > { %v1033_v27 = vadd.f32 %v1005_v2, %v973_v36  ;;  %v882_v41 = vadd.f32 %v854_v8, %v822_v5  ;;  %v1006_v40 = vmul.f32 %v1824_v20, %v2045_v14  ;;  %v1066_v11 = vmul.f32 %v1836_v30, %v2101_v19 }
  0x89   : > { %v736_v62 = vmul.f32 %v1813_v10, %v2028_v0  ;;  %v525_v15 = vmul.f32 %v1805_v6, %v2030_v61  ;;  %v823_v49 = vadd.f32 %v795_v58, %v763_v28  ;;  %v672_v34 = vadd.f32 %v644_v16, %v612_v23  ;;  %v2147_v58 = vld [vmem:[#allocation2 + $0xe7] sm:$0x3f] }
  0x8a   : > { %v1093_v12 = vadd.f32 %v1065_v26, %v1033_v27  ;;  %v974_v33 = vadd.f32 %v946_v39, %v882_v41  ;;  %v947_v63 = vmul.f32 %v1817_v13, %v2018_v47  ;;  %v1007_v59 = vmul.f32 %v1824_v20, %v2089_v32  ;;  %v2166_v41 = vld [vmem:[#allocation2 + $0xf7] sm:$0xff] }
  0x8b   : > { %v1067_v0 = vmul.f32 %v1836_v30, %v2114_v25  ;;  %v585_v61 = vmul.f32 %v1807_v7, %v2070_v51  ;;  %v883_v3 = vadd.f32 %v855_v37, %v823_v49  ;;  %v764_v2 = vadd.f32 %v736_v62, %v672_v34 }
  0x8c   : > { %1121 = vst [vmem:[%s1907_s20 + $0x50] sm:$0xff] %v1093_v12  ;;  %v1034_v1 = vadd.f32 %v1006_v40, %v974_v33  ;;  %v796_v43 = vmul.f32 %v1820_v17, %v2076_v24  ;;  %v856_v47 = vmul.f32 %v1822_v18, %v2124_v53  ;;  %v645_v55 = vmul.f32 %v1811_v9, %v2126_v56  ;;  %v2172_v12 = vld [vmem:[#allocation2 + $0xe8] sm:$0x3f] }
  0x8d   : > { %v613_v29 = vadd.f32 %v585_v61, %v525_v15  ;;  %v737_v38 = vmul.f32 %v1813_v10, %v1768_v46  ;;  %v975_v31 = vadd.f32 %v947_v63, %v883_v3  ;;  %v526_v45 = vmul.f32 %v1805_v6, %v2051_v22  ;;  %v2189_v3 = vld [vmem:[#allocation2 + $0xff] sm:$0x3f] }
  0x8e   : > { %v1094_v42 = vadd.f32 %v1066_v11, %v1034_v1  ;;  %v824_v8 = vadd.f32 %v796_v43, %v764_v2  ;;  %v948_v36 = vmul.f32 %v1817_v13, %v2045_v14  ;;  %v797_v35 = vmul.f32 %v1820_v17, %v1772_v48 }
  0x8f   : > { %v673_v5 = vadd.f32 %v645_v55, %v613_v29  ;;  %v586_v44 = vmul.f32 %v1807_v7, %v2093_v4  ;;  %v1035_v46 = vadd.f32 %v1007_v59, %v975_v31  ;;  %v1008_v39 = vmul.f32 %v1824_v20, %v2101_v19 }
  0x90   : > { %1122 = vst [vmem:[%s1907_s20 + $0x58] sm:$0x3f] %v1094_v42  ;;  %v884_v26 = vadd.f32 %v856_v47, %v824_v8  ;;  %v1068_v22 = vmul.f32 %v1836_v30, %v2141_v21  ;;  %v857_v14 = vmul.f32 %v1822_v18, %v1778_v50  ;;  %v646_v27 = vmul.f32 %v1811_v9, %v2147_v58  ;;  %v2197_v42 = vld [vmem:[#allocation2 + $0xe9] sm:$0x3f] }
  0x91   : > { %v765_v37 = vadd.f32 %v737_v38, %v673_v5  ;;  %v614_v16 = vadd.f32 %v586_v44, %v526_v45  ;;  %v1095_v28 = vadd.f32 %v1067_v0, %v1035_v46  ;;  %v949_v40 = vmul.f32 %v1817_v13, %v2089_v32  ;;  %v2185_v0 = vld [vmem:[#allocation2 + $0xe1] sm:$0xff]  ;;  %v2210_v46 = vld [vmem:[#allocation2 + $0xf9] sm:$0xff] }
  0x92   : > { %v976_v23 = vadd.f32 %v948_v36, %v884_v26  ;;  %v527_v11 = vmul.f32 %v1805_v6, %v2070_v51  ;;  %v738_v33 = vmul.f32 %v1813_v10, %v2076_v24  ;;  %v587_v49 = vmul.f32 %v1807_v7, %v2126_v56 }
  0x93   : > { %v825_v62 = vadd.f32 %v797_v35, %v765_v37  ;;  %v674_v15 = vadd.f32 %v646_v27, %v614_v16  ;;  %1123 = vst [vmem:[%s1907_s20 + $0x60] sm:$0xff] %v1095_v28  ;;  %v1009_v63 = vmul.f32 %v1824_v20, %v2114_v25  ;;  %v798_v32 = vmul.f32 %v1820_v17, %v2124_v53 }
  0x94   : > { %v1036_v34 = vadd.f32 %v1008_v39, %v976_v23  ;;  %v647_v51 = vmul.f32 %v1811_v9, %v2166_v41  ;;  %v615_v24 = vadd.f32 %v587_v49, %v527_v11  ;;  %v739_v1 = vmul.f32 %v1813_v10, %v1772_v48  ;;  %v2220_v23 = vld [vmem:[#allocation2 + $0x100] sm:$0x3f] }
  0x95   : > { %v885_v59 = vadd.f32 %v857_v14, %v825_v62  ;;  %v766_v61 = vadd.f32 %v738_v33, %v674_v15  ;;  %v858_v43 = vmul.f32 %v1822_v18, %v2172_v12  ;;  %v799_v47 = vmul.f32 %v1820_v17, %v1778_v50 }
  0x96   : > { %v1096_v2 = vadd.f32 %v1068_v22, %v1036_v34  ;;  %v528_v29 = vmul.f32 %v1805_v6, %v2093_v4  ;;  %v675_v31 = vadd.f32 %v647_v51, %v615_v24  ;;  %v588_v48 = vmul.f32 %v1807_v7, %v2147_v58 }
  0x97   : > { %v977_v55 = vadd.f32 %v949_v40, %v885_v59  ;;  %v826_v38 = vadd.f32 %v798_v32, %v766_v61  ;;  %v1069_v8 = vmul.f32 %v1836_v30, %v2185_v0  ;;  %v950_v45 = vmul.f32 %v1817_v13, %v2101_v19  ;;  %v2222_v40 = vld [vmem:[#allocation2 + $0x10f] sm:$0xff] }
  0x98   : > { %1124 = vst [vmem:[%s1907_s20 + $0x68] sm:$0x3f] %v1096_v2  ;;  %v859_v36 = vmul.f32 %v1822_v18, %v1783_v52  ;;  %v648_v4 = vmul.f32 %v1811_v9, %v2189_v3  ;;  %v767_v44 = vadd.f32 %v739_v1, %v675_v31  ;;  %v616_v26 = vadd.f32 %v588_v48, %v528_v29  ;;  %v2243_v2 = vld [vmem:[#allocation2 + $0x117] sm:$0x3f] }
  0x99   : > { %v1037_v5 = vadd.f32 %v1009_v63, %v977_v55  ;;  %v886_v35 = vadd.f32 %v858_v43, %v826_v38  ;;  %v1010_v39 = vmul.f32 %v1824_v20, %v2141_v21  ;;  %v1070_v22 = vmul.f32 %v1836_v30, %v2197_v42  ;;  %v2237_v63 = vld [vmem:[#allocation2 + $0x101] sm:$0x3f] }
  0x9a   : > { %v740_v19 = vmul.f32 %v1813_v10, %v2124_v53  ;;  %v529_v37 = vmul.f32 %v1805_v6, %v2126_v56  ;;  %v827_v27 = vadd.f32 %v799_v47, %v767_v44  ;;  %v676_v28 = vadd.f32 %v648_v4, %v616_v26  ;;  %v2262_v4 = vld [vmem:[#allocation2 + $0x127] sm:$0xff] }
  0x9b   : > { %v1097_v14 = vadd.f32 %v1069_v8, %v1037_v5  ;;  %v978_v16 = vadd.f32 %v950_v45, %v886_v35  ;;  %v951_v11 = vmul.f32 %v1817_v13, %v2114_v25  ;;  %v1011_v62 = vmul.f32 %v1824_v20, %v2185_v0 }
  0x9c   : > { %v1071_v53 = vmul.f32 %v1836_v30, %v2210_v46  ;;  %v589_v56 = vmul.f32 %v1807_v7, %v2166_v41  ;;  %v887_v33 = vadd.f32 %v859_v36, %v827_v27  ;;  %v768_v49 = vadd.f32 %v740_v19, %v676_v28  ;;  %v2268_v19 = vld [vmem:[#allocation2 + $0x118] sm:$0x3f] }
  0x9d   : > { %1125 = vst [vmem:[%s1907_s20 + $0x70] sm:$0xff] %v1097_v14  ;;  %v1038_v15 = vadd.f32 %v1010_v39, %v978_v16  ;;  %v800_v34 = vmul.f32 %v1820_v17, %v2172_v12  ;;  %v860_v25 = vmul.f32 %v1822_v18, %v2220_v23  ;;  %v649_v51 = vmul.f32 %v1811_v9, %v2222_v40 }
  0x9e   : > { %v617_v32 = vadd.f32 %v589_v56, %v529_v37  ;;  %v741_v59 = vmul.f32 %v1813_v10, %v1778_v50  ;;  %v979_v24 = vadd.f32 %v951_v11, %v887_v33  ;;  %v530_v43 = vmul.f32 %v1805_v6, %v2147_v58  ;;  %v2281_v11 = vld [vmem:[#allocation2 + $0x111] sm:$0xff] }
  0x9f   : > { %v1098_v61 = vadd.f32 %v1070_v22, %v1038_v15  ;;  %v828_v1 = vadd.f32 %v800_v34, %v768_v49  ;;  %v952_v47 = vmul.f32 %v1817_v13, %v2141_v21  ;;  %v801_v55 = vmul.f32 %v1820_v17, %v1783_v52  ;;  %v2285_v56 = vld [vmem:[#allocation2 + $0x12f] sm:$0x3f] }
  0xa0   : > { %v677_v29 = vadd.f32 %v649_v51, %v617_v32  ;;  %v590_v38 = vmul.f32 %v1807_v7, %v2189_v3  ;;  %v1039_v50 = vadd.f32 %v1011_v62, %v979_v24  ;;  %v1012_v48 = vmul.f32 %v1824_v20, %v2197_v42  ;;  %v2293_v51 = vld [vmem:[#allocation2 + $0x119] sm:$0x3f] }
  0xa1   : > { %1126 = vst [vmem:[%s1907_s20 + $0x78] sm:$0x3f] %v1098_v61  ;;  %v888_v31 = vadd.f32 %v860_v25, %v828_v1  ;;  %v1072_v58 = vmul.f32 %v1836_v30, %v2237_v63  ;;  %v861_v21 = vmul.f32 %v1822_v18, %v1787_v54  ;;  %v650_v36 = vmul.f32 %v1811_v9, %v2243_v2 }
  0xa2   : > { %v769_v8 = vadd.f32 %v741_v59, %v677_v29  ;;  %v618_v45 = vadd.f32 %v590_v38, %v530_v43  ;;  %v1099_v5 = vadd.f32 %v1071_v53, %v1039_v50  ;;  %v953_v44 = vmul.f32 %v1817_v13, %v2185_v0 }
  0xa3   : > { %v980_v35 = vadd.f32 %v952_v47, %v888_v31  ;;  %v531_v26 = vmul.f32 %v1805_v6, %v2166_v41  ;;  %v742_v37 = vmul.f32 %v1813_v10, %v2172_v12  ;;  %v591_v14 = vmul.f32 %v1807_v7, %v2222_v40 }
  0xa4   : > { %v829_v39 = vadd.f32 %v801_v55, %v769_v8  ;;  %v678_v22 = vadd.f32 %v650_v36, %v618_v45  ;;  %1127 = vst [vmem:[%s1907_s20 + $0x80] sm:$0xff] %v1099_v5  ;;  %v1013_v27 = vmul.f32 %v1824_v20, %v2210_v46  ;;  %v802_v0 = vmul.f32 %v1820_v17, %v2220_v23  ;;  %v2306_v55 = vld [vmem:[#allocation2 + $0x129] sm:$0xff]  ;;  %v2318_v5 = vld [vmem:[#allocation2 + $0x13f] sm:$0xff] }
  0xa5   : > { %v1040_v16 = vadd.f32 %v1012_v48, %v980_v35  ;;  %v651_v41 = vmul.f32 %v1811_v9, %v2262_v4  ;;  %v619_v12 = vadd.f32 %v591_v14, %v531_v26  ;;  %v743_v53 = vmul.f32 %v1813_v10, %v1783_v52  ;;  %v2316_v36 = vld [vmem:[#allocation2 + $0x130] sm:$0x3f] }
  0xa6   : > { %v889_v28 = vadd.f32 %v861_v21, %v829_v39  ;;  %v770_v62 = vadd.f32 %v742_v37, %v678_v22  ;;  %v862_v33 = vmul.f32 %v1822_v18, %v2268_v19  ;;  %v803_v49 = vmul.f32 %v1820_v17, %v1787_v54  ;;  %v2333_v14 = vld [vmem:[#allocation2 + $0x131] sm:$0x3f] }
  0xa7   : > { %v1100_v15 = vadd.f32 %v1072_v58, %v1040_v16  ;;  %v532_v34 = vmul.f32 %v1805_v6, %v2189_v3  ;;  %v679_v59 = vadd.f32 %v651_v41, %v619_v12  ;;  %v592_v52 = vmul.f32 %v1807_v7, %v2243_v2  ;;  %v2339_v12 = vld [vmem:[#allocation2 + $0x147] sm:$0x3f] }
  0xa8   : > { %v981_v25 = vadd.f32 %v953_v44, %v889_v28  ;;  %v830_v32 = vadd.f32 %v802_v0, %v770_v62  ;;  %v1073_v61 = vmul.f32 %v1836_v30, %v2281_v11  ;;  %v954_v24 = vmul.f32 %v1817_v13, %v2197_v42 }
  0xa9   : > { %1128 = vst [vmem:[%s1907_s20 + $0x88] sm:$0x3f] %v1100_v15  ;;  %v863_v1 = vmul.f32 %v1822_v18, %v1793_v57  ;;  %v652_v3 = vmul.f32 %v1811_v9, %v2285_v56  ;;  %v771_v29 = vadd.f32 %v743_v53, %v679_v59  ;;  %v620_v38 = vadd.f32 %v592_v52, %v532_v34 }
  0xaa   : > { %v1041_v43 = vadd.f32 %v1013_v27, %v981_v25  ;;  %v890_v47 = vadd.f32 %v862_v33, %v830_v32  ;;  %v1014_v50 = vmul.f32 %v1824_v20, %v2237_v63  ;;  %v1074_v31 = vmul.f32 %v1836_v30, %v2293_v51 }
  0xab   : > { %v744_v42 = vmul.f32 %v1813_v10, %v2220_v23  ;;  %v533_v48 = vmul.f32 %v1805_v6, %v2222_v40  ;;  %v831_v21 = vadd.f32 %v803_v49, %v771_v29  ;;  %v680_v45 = vadd.f32 %v652_v3, %v620_v38  ;;  %v2362_v38 = vld [vmem:[#allocation2 + $0x148] sm:$0x3f] }
  0xac   : > { %v1101_v58 = vadd.f32 %v1073_v61, %v1041_v43  ;;  %v982_v8 = vadd.f32 %v954_v24, %v890_v47  ;;  %v955_v35 = vmul.f32 %v1817_v13, %v2210_v46  ;;  %v1015_v44 = vmul.f32 %v1824_v20, %v2281_v11  ;;  %v503_v61 = vld [vmem:[#allocation2 + $0x157] sm:$0xff] }
  0xad   : > { %v1075_v23 = vmul.f32 %v1836_v30, %v2306_v55  ;;  %v593_v40 = vmul.f32 %v1807_v7, %v2262_v4  ;;  %v891_v39 = vadd.f32 %v863_v1, %v831_v21  ;;  %v772_v22 = vadd.f32 %v744_v42, %v680_v45 }
  0xae   : > { %1129 = vst [vmem:[%s1907_s20 + $0x90] sm:$0xff] %v1101_v58  ;;  %v1042_v26 = vadd.f32 %v1014_v50, %v982_v8  ;;  %v804_v37 = vmul.f32 %v1820_v17, %v2268_v19  ;;  %v864_v46 = vmul.f32 %v1822_v18, %v2316_v36  ;;  %v653_v27 = vmul.f32 %v1811_v9, %v2318_v5  ;;  %v2374_v58 = vld [vmem:[#allocation2 + $0x141] sm:$0xff] }
  0xaf   : > { %v621_v16 = vadd.f32 %v593_v40, %v533_v48  ;;  %v745_v0 = vmul.f32 %v1813_v10, %v1787_v54  ;;  %v983_v28 = vadd.f32 %v955_v35, %v891_v39  ;;  %v534_v53 = vmul.f32 %v1805_v6, %v2243_v2  ;;  %v504_v35 = vld [vmem:[#allocation2 + $0x15f] sm:$0x3f] }
  0xb0   : > { %v1102_v41 = vadd.f32 %v1074_v31, %v1042_v26  ;;  %v832_v62 = vadd.f32 %v804_v37, %v772_v22  ;;  %v956_v15 = vmul.f32 %v1817_v13, %v2237_v63  ;;  %v805_v49 = vmul.f32 %v1820_v17, %v1793_v57  ;;  %v1470_v40 = vld [vmem:[#allocation2 + $0x140] sm:$0xff] }
  0xb1   : > { %v681_v33 = vadd.f32 %v653_v27, %v621_v16  ;;  %v594_v34 = vmul.f32 %v1807_v7, %v2285_v56  ;;  %v1043_v54 = vadd.f32 %v1015_v44, %v983_v28  ;;  %v1016_v32 = vmul.f32 %v1824_v20, %v2293_v51  ;;  %v715_v16 = vld [vmem:[#allocation2 + $0x158] sm:$0xff] }
  0xb2   : > { %1130 = vst [vmem:[%s1907_s20 + $0x98] sm:$0x3f] %v1102_v41  ;;  %v892_v25 = vadd.f32 %v864_v46, %v832_v62  ;;  %v1076_v2 = vmul.f32 %v1836_v30, %v2333_v14  ;;  %v865_v63 = vmul.f32 %v1822_v18, %v1798_v60  ;;  %v654_v57 = vmul.f32 %v1811_v9, %v2339_v12 }
  0xb3   : > { %v773_v59 = vadd.f32 %v745_v0, %v681_v33  ;;  %v622_v52 = vadd.f32 %v594_v34, %v534_v53  ;;  %v1103_v24 = vadd.f32 %v1075_v23, %v1043_v54  ;;  %v957_v3 = vmul.f32 %v1817_v13, %v2281_v11 }
  0xb4   : > { %v984_v1 = vadd.f32 %v956_v15, %v892_v25  ;;  %v535_v43 = vmul.f32 %v1805_v6, %v2262_v4  ;;  %v746_v60 = vmul.f32 %v1813_v10, %v2268_v19  ;;  %v595_v50 = vmul.f32 %v1807_v7, %v2318_v5  ;;  %v1469_v19 = vld [vmem:[#allocation2 + $0x128] sm:$0xff] }
  0xb5   : > { %v833_v47 = vadd.f32 %v805_v49, %v773_v59  ;;  %v682_v29 = vadd.f32 %v654_v57, %v622_v52  ;;  %1131 = vst [vmem:[%s1907_s20 + $0xa0] sm:$0xff] %v1103_v24  ;;  %v1017_v42 = vmul.f32 %v1824_v20, %v2306_v55  ;;  %v806_v11 = vmul.f32 %v1820_v17, %v2316_v36  ;;  %v2390_v15 = vld [vmem:[#allocation2 + $0x149] sm:$0x3f]  ;;  %v505_v49 = vld [vmem:[#allocation2 + $0x16f] sm:$0xff]  ;;  %v716_v52 = vld [vmem:[#allocation2 + $0x160] sm:$0x3f] }
  0xb6   : > { %v1044_v31 = vadd.f32 %v1016_v32, %v984_v1  ;;  %v655_v4 = vmul.f32 %v1811_v9, %v503_v61  ;;  %v623_v21 = vadd.f32 %v595_v50, %v535_v43  ;;  %v747_v45 = vmul.f32 %v1469_v19, %v1813_v10 }
  0xb7   : > { %v893_v48 = vadd.f32 %v865_v63, %v833_v47  ;;  %v774_v8 = vadd.f32 %v746_v60, %v682_v29  ;;  %v866_v23 = vmul.f32 %v1822_v18, %v2362_v38  ;;  %v807_v26 = vmul.f32 %v1470_v40, %v1820_v17  ;;  %v506_v29 = vld [vmem:[#allocation2 + $0x177] sm:$0x3f] }
  0xb8   : > { %v1104_v44 = vadd.f32 %v1076_v2, %v1044_v31  ;;  %v536_v39 = vmul.f32 %v1805_v6, %v2285_v56  ;;  %v683_v46 = vadd.f32 %v655_v4, %v623_v21  ;;  %v596_v27 = vmul.f32 %v1807_v7, %v2339_v12  ;;  %v927_v60 = vld [vmem:[#allocation2 + $0x159] sm:$0xff] }
  0xb9   : > { %v985_v22 = vadd.f32 %v957_v3, %v893_v48  ;;  %v834_v37 = vadd.f32 %v806_v11, %v774_v8  ;;  %v1077_v0 = vmul.f32 %v1836_v30, %v2374_v58  ;;  %v958_v41 = vmul.f32 %v1817_v13, %v2293_v51 }
  0xba   : > { %1132 = vst [vmem:[%s1907_s20 + $0xa8] sm:$0x3f] %v1104_v44  ;;  %v656_v28 = vmul.f32 %v1811_v9, %v504_v35  ;;  %v775_v56 = vadd.f32 %v747_v45, %v683_v46  ;;  %v624_v33 = vadd.f32 %v596_v27, %v536_v39  ;;  %v1018_v34 = vmul.f32 %v1824_v20, %v2333_v14 }
  0xbb   : > { %v1045_v62 = vadd.f32 %v1017_v42, %v985_v22  ;;  %v894_v53 = vadd.f32 %v866_v23, %v834_v37  ;;  %v867_v54 = vmul.f32 %v1822_v18, %v715_v16  ;;  %v748_v25 = vmul.f32 %v1813_v10, %v2316_v36  ;;  %v1471_v37 = vld [vmem:[#allocation2] sm:$0xff] }
  0xbc   : > { %v537_v51 = vmul.f32 %v1805_v6, %v2318_v5  ;;  %v835_v59 = vadd.f32 %v807_v26, %v775_v56  ;;  %v684_v63 = vadd.f32 %v656_v28, %v624_v33  ;;  %v1078_v57 = vmul.f32 %v1836_v30, %v2390_v15  ;;  %v928_v26 = vld [vmem:[#allocation2 + $0x161] sm:$0x3f] }
  0xbd   : > { %v1105_v32 = vadd.f32 %v1077_v0, %v1045_v62  ;;  %v986_v2 = vadd.f32 %v958_v41, %v894_v53  ;;  %v959_v24 = vmul.f32 %v1817_v13, %v2306_v55  ;;  %v597_v1 = vmul.f32 %v1807_v7, %v503_v61 }
  0xbe   : > { %v657_v3 = vmul.f32 %v1811_v9, %v505_v49  ;;  %v895_v43 = vadd.f32 %v867_v54, %v835_v59  ;;  %v776_v5 = vadd.f32 %v748_v25, %v684_v63  ;;  %v808_v47 = vmul.f32 %v1820_v17, %v2362_v38  ;;  %v929_v49 = vld [vmem:[#allocation2 + $0x171] sm:$0xff] }
  0xbf   : > { %1133 = vst [vmem:[%s1907_s20 + $0xb0] sm:$0xff] %v1105_v32  ;;  %v1046_v36 = vadd.f32 %v1018_v34, %v986_v2  ;;  %v1019_v50 = vmul.f32 %v1824_v20, %v2374_v58  ;;  %v868_v31 = vmul.f32 %v1822_v18, %v716_v52  ;;  %v625_v55 = vadd.f32 %v597_v1, %v537_v51  ;;  %v930_v2 = vld [vmem:[#allocation2 + $0x179] sm:$0x3f]  ;;  %v1241_v1 = vld [vmem:[%s1907_s20 + $0x28] sm:$0xff] (%p1638_p10) }
  0xc0   : > { %v749_v61 = vmul.f32 %v1470_v40, %v1813_v10  ;;  %v987_v11 = vadd.f32 %v959_v24, %v895_v43  ;;  %v836_v4 = vadd.f32 %v808_v47, %v776_v5  ;;  %v538_v48 = vmul.f32 %v1805_v6, %v2339_v12  ;;  %v1247_v43 = vld [vmem:[%s1907_s20 + $0x40] sm:$0xff] (%p1638_p10)  ;;  %v1249_v5 = vld [vmem:[%s1907_s20 + $0x48] sm:$0xff] (%p1638_p10)  ;;  %v1251_v47 = vld [vmem:[%s1907_s20 + $0x50] sm:$0xff] (%p1638_p10)  ;;  %1242 = vst [vmem:[%s2460_s13 + $0x78] sm:$0xff] (%p1638_p10), %v1241_v1 }
  0xc1   : > { %v1106_v42 = vadd.f32 %v1078_v57, %v1046_v36  ;;  %v685_v8 = vadd.f32 %v657_v3, %v625_v55  ;;  %v598_v21 = vmul.f32 %v1807_v7, %v504_v35  ;;  %v658_v19 = vmul.f32 %v1811_v9, %v506_v29  ;;  %v1243_v3 = vld [vmem:[%s1907_s20 + $0x30] sm:$0xff] (%p1638_p10)  ;;  %v1245_v36 = vld [vmem:[%s1907_s20 + $0x38] sm:$0xff] (%p1638_p10)  ;;  %1248 = vst [vmem:[%s2460_s13 + $0xc0] sm:$0xff] (%p1638_p10), %v1247_v43 }
  0xc2   : > { %v1047_v45 = vadd.f32 %v1019_v50, %v987_v11  ;;  %v1079_v44 = vmul.f32 %v1836_v30, %v927_v60  ;;  %v896_v23 = vadd.f32 %v868_v31, %v836_v4  ;;  %v960_v40 = vmul.f32 %v1817_v13, %v2333_v14  ;;  %v1253_v29 = vld [vmem:[%s1907_s20 + $0x58] sm:$0xff] (%p1638_p10)  ;;  %v1257_v50 = vld [vmem:[%s1907_s20 + $0x68] sm:$0xff] (%p1638_p10)  ;;  %v1259_v31 = vld [vmem:[%s1907_s20 + $0x70] sm:$0xff] (%p1638_p10)  ;;  %1244 = vst [vmem:[%s2460_s13 + $0x90] sm:$0xff] (%p1638_p10), %v1243_v3 }
  0xc3   : > { %1134 = vst [vmem:[%s1907_s20 + $0xb8] sm:$0x3f] %v1106_v42  ;;  %v777_v39 = vadd.f32 %v749_v61, %v685_v8  ;;  %v809_v22 = vmul.f32 %v1820_v17, %v715_v16  ;;  %v869_v6 = vmul.f32 %v1471_v37, %v1822_v18  ;;  %v626_v12 = vadd.f32 %v598_v21, %v538_v48  ;;  %v718_v16 = vld [vmem:[#allocation2 + $0x178] sm:$0x3f]  ;;  %v1261_v55 = vld [vmem:[%s1907_s20 + $0x78] sm:$0xff] (%p1638_p10)  ;;  %v1265_v42 = vld [vmem:[%s1907_s20 + $0x88] sm:$0xff] (%p1638_p10) }
  0xc4   : > { %v1107_v7 = vadd.f32 %v1079_v44, %v1047_v45  ;;  %v988_v35 = vadd.f32 %v960_v40, %v896_v23  ;;  %v1020_v9 = vmul.f32 %v1824_v20, %v2390_v15  ;;  %v750_v0 = vmul.f32 %v1813_v10, %v2362_v38  ;;  %1246 = vst [vmem:[%s2460_s13 + $0xa8] sm:$0xff] (%p1638_p10), %v1245_v36  ;;  %v1263_v61 = vld [vmem:[%s1907_s20 + $0x80] sm:$0xff] (%p1638_p10)  ;;  %v1267_v11 = vld [vmem:[%s1907_s20 + $0x90] sm:$0xff] (%p1638_p10)  ;;  %v1269_v4 = vld [vmem:[%s1907_s20 + $0x98] sm:$0xff] (%p1638_p10) }
  0xc5   : > { %v837_v46 = vadd.f32 %v809_v22, %v777_v39  ;;  %v686_v27 = vadd.f32 %v658_v19, %v626_v12  ;;  %v1080_v41 = vmul.f32 %v1836_v30, %v928_v26  ;;  %v961_v62 = vmul.f32 %v1817_v13, %v2374_v58  ;;  %1250 = vst [vmem:[%s2460_s13 + $0xd8] sm:$0xff] (%p1638_p10), %v1249_v5  ;;  %v1271_v48 = vld [vmem:[%s1907_s20 + $0xa0] sm:$0xff] (%p1638_p10)  ;;  %v1273_v8 = vld [vmem:[%s1907_s20 + $0xa8] sm:$0xff] (%p1638_p10) }
  0xc6   : > { %1135 = vst [vmem:[%s1907_s20 + $0xc0] sm:$0xff] %v1107_v7  ;;  %v1048_v14 = vadd.f32 %v1020_v9, %v988_v35  ;;  %v810_v56 = vmul.f32 %v1820_v17, %v716_v52  ;;  %v1021_v54 = vmul.f32 %v1824_v20, %v927_v60  ;;  %v870_v38 = vmul.f32 %v1822_v18, %v718_v16  ;;  %v1233_v18 = vld [vmem:[%s1907_s20 + $0x8] sm:$0xff] (%p1638_p10)  ;;  %v1255_v60 = vld [vmem:[%s1907_s20 + $0x60] sm:$0xff] (%p1638_p10)  ;;  %v1275_v21 = vld [vmem:[%s1907_s20 + $0xb0] sm:$0xff] (%p1638_p10) }
  0xc7   : > { %v897_v28 = vadd.f32 %v869_v6, %v837_v46  ;;  %v778_v53 = vadd.f32 %v750_v0, %v686_v27  ;;  %v1081_v51 = vmul.f32 %v1836_v30, %v929_v49  ;;  %v962_v58 = vmul.f32 %v1817_v13, %v2390_v15  ;;  %v1231_v13 = vld [vmem:[%s1907_s20] sm:$0xff] (%p1638_p10)  ;;  %1234 = vst [vmem:[%s2460_s13 + $0x18] sm:$0xff] (%p1638_p10), %v1233_v18 }
  0xc8   : > { %v1108_v33 = vadd.f32 %v1080_v41, %v1048_v14  ;;  %v1022_v63 = vmul.f32 %v1824_v20, %v928_v26  ;;  %v1082_v57 = vmul.f32 %v1836_v30, %v930_v2  ;;  %v1235_v20 = vld [vmem:[%s1907_s20 + $0x10] sm:$0xff] (%p1638_p10)  ;;  %v1237_v30 = vld [vmem:[%s1907_s20 + $0x18] sm:$0xff] (%p1638_p10)  ;;  %v1239_v15 = vld [vmem:[%s1907_s20 + $0x20] sm:$0xff] (%p1638_p10)  ;;  %1232 = vst [vmem:[%s2460_s13] sm:$0xff] (%p1638_p10), %v1231_v13 }
  0xc9   : > { %v989_v34 = vadd.f32 %v961_v62, %v897_v28  ;;  %v838_v10 = vadd.f32 %v810_v56, %v778_v53  ;;  %1236 = vst [vmem:[%s2460_s13 + $0x30] sm:$0xff] (%p1638_p10), %v1235_v20  ;;  %1238 = vst [vmem:[%s2460_s13 + $0x48] sm:$0xff] (%p1638_p10), %v1237_v30 }
  0xca   : > { %1136 = vst [vmem:[%s1907_s20 + $0xc8] sm:$0x3f] %v1108_v33  ;;  %1240 = vst [vmem:[%s2460_s13 + $0x60] sm:$0xff] (%p1638_p10), %v1239_v15  ;;  %v1277_v19 = vld [vmem:[%s1907_s20 + $0xb8] sm:$0xff] (%p1638_p10) }
  0xcb   : > { %v1049_v25 = vadd.f32 %v1021_v54, %v989_v34  ;;  %v898_v32 = vadd.f32 %v870_v38, %v838_v10  ;;  %1252 = vst [vmem:[%s2460_s13 + $0xf0] sm:$0xff] (%p1638_p10), %v1251_v47  ;;  %1254 = vst [vmem:[%s2460_s13 + $0x108] sm:$0xff] (%p1638_p10), %v1253_v29 }
  0xcc   : > { %1256 = vst [vmem:[%s2460_s13 + $0x120] sm:$0xff] (%p1638_p10), %v1255_v60  ;;  %1258 = vst [vmem:[%s2460_s13 + $0x138] sm:$0xff] (%p1638_p10), %v1257_v50 }
  0xcd   : > { %v1109_v17 = vadd.f32 %v1081_v51, %v1049_v25  ;;  %v990_v59 = vadd.f32 %v962_v58, %v898_v32  ;;  %1145 = sbr.rel (!%p1638_p10) target bundleno = 220 (0xdc), region = 111  ;;  %1260 = vst [vmem:[%s2460_s13 + $0x150] sm:$0xff] (%p1638_p10), %v1259_v31  ;;  %1262 = vst [vmem:[%s2460_s13 + $0x168] sm:$0xff] (%p1638_p10), %v1261_v55  ;;  %v1279_v45 = vld [vmem:[%s1907_s20 + $0xc0] sm:$0xff] (%p1638_p10) }
  0xce   : > { %1264 = vst [vmem:[%s2460_s13 + $0x180] sm:$0xff] (%p1638_p10), %v1263_v61  ;;  %1266 = vst [vmem:[%s2460_s13 + $0x198] sm:$0xff] (%p1638_p10), %v1265_v42 }
  0xcf   : > { %1137 = vst [vmem:[%s1907_s20 + $0xd0] sm:$0xff] %v1109_v17  ;;  %v1050_v52 = vadd.f32 %v1022_v63, %v990_v59  ;;  %1268 = vst [vmem:[%s2460_s13 + $0x1b0] sm:$0xff] (%p1638_p10), %v1267_v11 }
  0xd0   : > { %1270 = vst [vmem:[%s2460_s13 + $0x1c8] sm:$0xff] (%p1638_p10), %v1269_v4  ;;  %1272 = vst [vmem:[%s2460_s13 + $0x1e0] sm:$0xff] (%p1638_p10), %v1271_v48 }
  0xd1   : > { %v1110_v24 = vadd.f32 %v1082_v57, %v1050_v52  ;;  %1274 = vst [vmem:[%s2460_s13 + $0x1f8] sm:$0xff] (%p1638_p10), %v1273_v8  ;;  %1276 = vst [vmem:[%s2460_s13 + $0x210] sm:$0xff] (%p1638_p10), %v1275_v21  ;;  %v1281_v44 = vld [vmem:[%s1907_s20 + $0xc8] sm:$0xff] (%p1638_p10) }
  0xd2   : > { %1278 = vst [vmem:[%s2460_s13 + $0x228] sm:$0xff] (%p1638_p10), %v1277_v19  ;;  %1280 = vst [vmem:[%s2460_s13 + $0x240] sm:$0xff] (%p1638_p10), %v1279_v45 }
  0xd3   : > { %1138 = vst [vmem:[%s1907_s20 + $0xd8] sm:$0x3f] %v1110_v24  ;;  %1282 = vst [vmem:[%s2460_s13 + $0x258] sm:$0xff] (%p1638_p10), %v1281_v44 }
  0xd6   : > { %v1283_v23 = vld [vmem:[%s1907_s20 + $0xd0] sm:$0xff] }
  0xd7   : > { %1284 = vst [vmem:[%s2460_s13 + $0x270] sm:$0xff] %v1283_v23 }
  0xda   : > { %v1285_v40 = vld [vmem:[%s1907_s20 + $0xd8] sm:$0xff] }
  0xdb   : > { %1286 = vst [vmem:[%s2460_s13 + $0x288] sm:$0xff] %v1285_v40 }
  0xdc PF: > { %s12_s17 = sadd.s32 1, %s1542_s17   ;;  %s2539_s9 = smov %s1514_s10 }
  0xdd   : > { %p9_p1 = scmp.ge.s32.totalorder %s12_s17, 8   ;;  %s2540_s10 = smov %s1643_s29 }
  0xde   : > { %s2541_s11 = smov %s1522_s12  ;;  %s2542_s12 = smov %s1646_s30 }
  0xdf   : > { %s2543_s13 = smov %s1534_s15  ;;  %s2544_s14 = smov %s1538_s16 }
  0xe0   : > { %s2545_s15 = smov %s2548_s18  ;;  %s2546_s16 = smov %s2552_s19 }
  0xe1   :  { %11 = sbr.rel (!%p9_p1) target bundleno = 5 (0x5), region = 189 }

</bundles_post_ra>
